<compile_context>
chip_gen: v7x
topology: tpu7x:2x2x1
jax: 0.10.0
libtpu: 0.0.40
codegen_flags: <defaults>
</compile_context>

<pallas_src>
import jax
import jax.numpy as jnp
from jax import lax
from jax.experimental import pallas as pl
from jax.experimental.pallas import tpu as pltpu


def _round_up(x, m):
    return ((x + m - 1) // m) * m


def _pick_tile(m, cap=1024):
    """Lane tile: multiple of 128, capped so per-step VMEM stays small, and
    split so the grid has >=2 steps (v7x megacore) whenever m allows it."""
    t = min(cap, _round_up(m, 128))
    if m > 128 and _round_up(m, t) // t < 2:
        t = max(128, _round_up((m + 1) // 2, 128))
    return t


# ------------------------------ fused kernel --------------------------------


def _fused_unet_kernel(neigh_ref, wbig_ref, b1_ref, wt_ref, bt_ref,
                       w3_ref, b3_ref, o_ref):
    """Whole network on one column tile (channels-major, lane-dense).

    neigh_ref: (Cin*64, tm) bf16  4x4x4 input neighbourhood per pooled voxel
    wbig_ref:  (256, Cin*64) bf16 conv1 weights expanded per pool position
    b1_ref:    (32, 1)   f32
    wt_ref:    (128, 32) bf16     ConvTranspose weights, 8 positions stacked
    bt_ref:    (128, 1)  f32      ConvTranspose bias tiled over 8 positions
    w3_ref:    (64, 128) bf16     1x1 conv as block-diagonal matmul
    b3_ref:    (64, 1)   f32
    o_ref:     (64, tm)  bf16     rows = pos*8 + cout_pad
    """
    # -- encoder: Conv3d(k=3, pad=1) + ReLU + MaxPool3d(2, 2) ----------------
    # One full-row MXU matmul gives all 8 pre-pool conv outputs at once.
    y = jnp.dot(wbig_ref[...], neigh_ref[...],
                preferred_element_type=jnp.float32)           # (256, tm)
    acc = y[0:32]
    for g in range(1, 8):                                     # pool = VPU max
        acc = jnp.maximum(acc, y[32 * g:32 * (g + 1)])
    # bias + ReLU commute with the max (bias constant over pool candidates).
    pooled = jnp.maximum(acc + b1_ref[...], 0.0)              # (32, tm) f32

    # -- decoder: ConvTranspose3d(32->16, k=2, s=2) + ReLU -------------------
    u = jnp.dot(wt_ref[...], pooled.astype(jnp.bfloat16),
                preferred_element_type=jnp.float32)           # (128, tm)
    u = jnp.maximum(u + bt_ref[...], 0.0)

    # -- output: Conv3d(16->Cout, k=1) as block-diagonal matmul --------------
    z = jnp.dot(w3_ref[...], u.astype(jnp.bfloat16),
                preferred_element_type=jnp.float32) + b3_ref[...]  # (64, tm)
    o_ref[...] = z.astype(o_ref.dtype)


# --------------------------------- forward ----------------------------------


def unet3d_forward(params, x):
    """x: [N, Cin, D, H, W] (NCDHW) -> [N, Cout, D, H, W]."""
    N, Cin, D, H, W = x.shape
    assert D % 2 == 0 and H % 2 == 0 and W % 2 == 0
    D2, H2, W2 = D // 2, H // 2, W // 2
    Mp = N * D2 * H2 * W2                      # pooled spatial positions
    K2 = Cin * 64                              # 4x4x4 neighbourhood per voxel
    tm = _pick_tile(Mp)
    MpP = _round_up(Mp, tm)
    Cout = params["w3"].shape[0]
    CoutP = 8                                  # pad Cout for aligned stores

    # ---- glue: 4x4x4 stride-2 neighbourhood gather (bf16), channels-major.
    # neigh[ci*64 + a*16 + b*4 + c, (n,d2,h2,w2)] = xpad[n,ci,2d2+a,2h2+b,2w2+c]
    xp = jnp.pad(x.astype(jnp.bfloat16),
                 ((0, 0), (0, 0), (1, 1), (1, 1), (1, 1)))
    slabs = [xp[:, :, a:a + 2 * D2 - 1:2, b:b + 2 * H2 - 1:2, c:c + 2 * W2 - 1:2]
             for a in range(4) for b in range(4) for c in range(4)]
    t = jnp.stack(slabs, axis=2)               # (N, Cin, 64, D2, H2, W2)
    neigh = jnp.transpose(t, (1, 2, 0, 3, 4, 5)).reshape(K2, Mp)
    neigh = jnp.pad(neigh, ((0, 0), (0, MpP - Mp)))

    # ---- conv1 weights expanded onto the 4x4x4 neighbourhood, one 32-row
    # block per 2x2x2 pool position -> (256, Cin*64), full MXU row fill.
    w1 = params["w1"].astype(jnp.float32)      # (32, Cin, 3, 3, 3)
    wexp = jnp.zeros((8, 32, Cin, 4, 4, 4), jnp.float32)
    for pd in range(2):
        for ph in range(2):
            for pw in range(2):
                pos = pd * 4 + ph * 2 + pw
                wexp = wexp.at[pos, :, :, pd:pd + 3, ph:ph + 3, pw:pw + 3].set(w1)
    wbig = wexp.reshape(8 * 32, K2).astype(jnp.bfloat16)
    b1 = params["b1"].reshape(32, 1).astype(jnp.float32)

    # ---- ConvTranspose weights stacked over the 8 upsample positions:
    # wt_stk[pos*16 + cot, ci] = Wt[ci, cot, kd, kh, kw], pos = kd*4+kh*2+kw
    wt_stk = jnp.transpose(params["wt"], (2, 3, 4, 1, 0)).reshape(8 * 16, 32)
    wt_stk = wt_stk.astype(jnp.bfloat16)
    bt_t = jnp.tile(params["bt"], 8).reshape(8 * 16, 1).astype(jnp.float32)

    # ---- 1x1 conv as a block-diagonal (8*CoutP, 8*16) bf16 matmul.
    w3p = jnp.pad(params["w3"].reshape(Cout, 16).astype(jnp.float32),
                  ((0, CoutP - Cout), (0, 0)))
    w3blk = jnp.kron(jnp.eye(8, dtype=jnp.float32), w3p).astype(jnp.bfloat16)
    b3p = jnp.pad(params["b3"].astype(jnp.float32), (0, CoutP - Cout))
    b3blk = jnp.tile(b3p, 8).reshape(8 * CoutP, 1)

    grid = (MpP // tm,)
    dec = pl.pallas_call(
        _fused_unet_kernel,
        out_shape=jax.ShapeDtypeStruct((8 * CoutP, MpP), jnp.bfloat16),
        grid=grid,
        in_specs=[
            pl.BlockSpec((K2, tm), lambda i: (0, i)),
            pl.BlockSpec((8 * 32, K2), lambda i: (0, 0)),
            pl.BlockSpec((32, 1), lambda i: (0, 0)),
            pl.BlockSpec((8 * 16, 32), lambda i: (0, 0)),
            pl.BlockSpec((8 * 16, 1), lambda i: (0, 0)),
            pl.BlockSpec((8 * CoutP, 8 * 16), lambda i: (0, 0)),
            pl.BlockSpec((8 * CoutP, 1), lambda i: (0, 0)),
        ],
        out_specs=pl.BlockSpec((8 * CoutP, tm), lambda i: (0, i)),
        compiler_params=pltpu.CompilerParams(
            dimension_semantics=("parallel",)),
    )(neigh, wbig, b1, wt_stk, bt_t, w3blk, b3blk)

    # ---- glue: un-scatter the 2x2x2 upsample blocks back to NCDHW (f32).
    out = dec[:, :Mp].astype(jnp.float32).reshape(8, CoutP, Mp)[:, :Cout]
    out = out.reshape(2, 2, 2, Cout, N, D2, H2, W2)
    out = jnp.transpose(out, (4, 3, 5, 0, 6, 1, 7, 2))
    return out.reshape(N, Cout, D, H, W)


# ------------------------- reference & parameters ---------------------------


def unet3d_reference(params, x):
    """Pure-JAX f32 reference with PyTorch-equivalent semantics."""
    hp = lax.Precision.HIGHEST
    y = lax.conv_general_dilated(
        x, params["w1"], window_strides=(1, 1, 1),
        padding=((1, 1), (1, 1), (1, 1)),
        dimension_numbers=("NCDHW", "OIDHW", "NCDHW"), precision=hp)
    y = jnp.maximum(y + params["b1"][None, :, None, None, None], 0.0)
    N, C, D, H, W = y.shape
    y = y.reshape(N, C, D // 2, 2, H // 2, 2, W // 2, 2).max(axis=(3, 5, 7))
    t = jnp.einsum("ncdhw,coxyz->nodxhywz", y, params["wt"], precision=hp)
    N2, Co, D2, _, H2, _, W2, _ = t.shape
    t = t.reshape(N2, Co, 2 * D2, 2 * H2, 2 * W2)
    t = jnp.maximum(t + params["bt"][None, :, None, None, None], 0.0)
    w3 = params["w3"].reshape(params["w3"].shape[0], 16)
    out = jnp.einsum("ncdhw,oc->nodhw", t, w3, precision=hp)
    return out + params["b3"][None, :, None, None, None]


def init_params(key, in_channels, out_channels):
    """Deterministic synthetic parameters with PyTorch-equivalent shapes."""
    k1, k2, k3, k4, k5, k6 = jax.random.split(key, 6)
    return dict(
        w1=jax.random.normal(k1, (32, in_channels, 3, 3, 3), jnp.float32) * 0.1,
        b1=jax.random.normal(k2, (32,), jnp.float32) * 0.01,
        wt=jax.random.normal(k3, (32, 16, 2, 2, 2), jnp.float32) * 0.1,  # ConvTranspose3d: (Cin, Cout, kD, kH, kW)
        bt=jax.random.normal(k4, (16,), jnp.float32) * 0.01,
        w3=jax.random.normal(k5, (out_channels, 16, 1, 1, 1), jnp.float32) * 0.1,
        b3=jax.random.normal(k6, (out_channels,), jnp.float32) * 0.01,
    )


# --------------------------------- main -------------------------------------

if __name__ == "__main__":
    key = jax.random.PRNGKey(0)
    kx, kp = jax.random.split(key)

    N, Cin, Cout = 2, 4, 3
    D = H = W = 16  # spatial must be even (pool by 2, then upsample by 2)

    x = jax.random.normal(kx, (N, Cin, D, H, W), jnp.float32)
    params = init_params(kp, Cin, Cout)

    out = jax.block_until_ready(jax.jit(unet3d_forward)(params, x))
    assert out.shape == (N, Cout, D, H, W), out.shape
    assert bool(jnp.all(jnp.isfinite(out)))

    ref = jax.block_until_ready(jax.jit(unet3d_reference)(params, x))
    max_err = float(jnp.max(jnp.abs(out - ref)))
    assert max_err < 1e-1, f"max abs error vs reference: {max_err}"
    print("KERNEL_OK")
</pallas_src>

<mosaic_0001>
module attributes {stable_mosaic.version = 11 : i64} {
  func.func @_fused_unet_kernel(%arg0: i32, %arg1: memref<256x512xbf16, #tpu.memory_space<vmem>>, %arg2: memref<256x256xbf16, #tpu.memory_space<vmem>>, %arg3: memref<32x1xf32, #tpu.memory_space<vmem>>, %arg4: memref<128x32xbf16, #tpu.memory_space<vmem>>, %arg5: memref<128x1xf32, #tpu.memory_space<vmem>>, %arg6: memref<64x128xbf16, #tpu.memory_space<vmem>>, %arg7: memref<64x1xf32, #tpu.memory_space<vmem>>, %arg8: memref<64x512xbf16, #tpu.memory_space<vmem>>) attributes {dimension_semantics = [#tpu.dimension_semantics<parallel>], iteration_bounds = array<i64: 2>, scalar_prefetch = 0 : i64, scratch_operands = 0 : i64, tpu.core_type = #tpu.core_type<tc>, window_params = [{transform_indices = @transform_0, window_bounds = array<i64: 256, 512>}, {pipeline_mode = #tpu.pipeline_mode<synchronous>, transform_indices = @transform_1, window_bounds = array<i64: 256, 256>}, {pipeline_mode = #tpu.pipeline_mode<synchronous>, transform_indices = @transform_2, window_bounds = array<i64: 32, 1>}, {pipeline_mode = #tpu.pipeline_mode<synchronous>, transform_indices = @transform_3, window_bounds = array<i64: 128, 32>}, {pipeline_mode = #tpu.pipeline_mode<synchronous>, transform_indices = @transform_4, window_bounds = array<i64: 128, 1>}, {pipeline_mode = #tpu.pipeline_mode<synchronous>, transform_indices = @transform_5, window_bounds = array<i64: 64, 128>}, {pipeline_mode = #tpu.pipeline_mode<synchronous>, transform_indices = @transform_6, window_bounds = array<i64: 64, 1>}, {transform_indices = @transform_7, window_bounds = array<i64: 64, 512>}]} {
    %c0 = arith.constant 0 : index
    %c0_0 = arith.constant 0 : index
    %0 = vector.load %arg2[%c0, %c0_0] : memref<256x256xbf16, #tpu.memory_space<vmem>>, vector<256x256xbf16>
    %c0_1 = arith.constant 0 : index
    %c0_2 = arith.constant 0 : index
    %1 = vector.load %arg1[%c0_1, %c0_2] : memref<256x512xbf16, #tpu.memory_space<vmem>>, vector<256x512xbf16>
    %cst = arith.constant dense<0.000000e+00> : vector<256x512xf32>
    %2 = tpu.matmul %0, %1, %cst {dimension_numbers = #tpu.dot_dimension_numbers<[1], [0], [0], [1], [0, 0, 1, 1], [], []>} : vector<256x256xbf16>, vector<256x512xbf16>, vector<256x512xf32> -> vector<256x512xf32>
    %3 = vector.extract_strided_slice %2 {offsets = [0, 0], sizes = [32, 512], strides = [1, 1]} : vector<256x512xf32> to vector<32x512xf32>
    %4 = vector.extract_strided_slice %2 {offsets = [32, 0], sizes = [32, 512], strides = [1, 1]} : vector<256x512xf32> to vector<32x512xf32>
    %5 = arith.maximumf %3, %4 : vector<32x512xf32>
    %6 = vector.extract_strided_slice %2 {offsets = [64, 0], sizes = [32, 512], strides = [1, 1]} : vector<256x512xf32> to vector<32x512xf32>
    %7 = arith.maximumf %5, %6 : vector<32x512xf32>
    %8 = vector.extract_strided_slice %2 {offsets = [96, 0], sizes = [32, 512], strides = [1, 1]} : vector<256x512xf32> to vector<32x512xf32>
    %9 = arith.maximumf %7, %8 : vector<32x512xf32>
    %10 = vector.extract_strided_slice %2 {offsets = [128, 0], sizes = [32, 512], strides = [1, 1]} : vector<256x512xf32> to vector<32x512xf32>
    %11 = arith.maximumf %9, %10 : vector<32x512xf32>
    %12 = vector.extract_strided_slice %2 {offsets = [160, 0], sizes = [32, 512], strides = [1, 1]} : vector<256x512xf32> to vector<32x512xf32>
    %13 = arith.maximumf %11, %12 : vector<32x512xf32>
    %14 = vector.extract_strided_slice %2 {offsets = [192, 0], sizes = [32, 512], strides = [1, 1]} : vector<256x512xf32> to vector<32x512xf32>
    %15 = arith.maximumf %13, %14 : vector<32x512xf32>
    %16 = vector.extract_strided_slice %2 {offsets = [224, 0], sizes = [32, 512], strides = [1, 1]} : vector<256x512xf32> to vector<32x512xf32>
    %17 = arith.maximumf %15, %16 : vector<32x512xf32>
    %c0_3 = arith.constant 0 : index
    %c0_4 = arith.constant 0 : index
    %18 = vector.load %arg3[%c0_3, %c0_4] : memref<32x1xf32, #tpu.memory_space<vmem>>, vector<32x1xf32>
    %19 = vector.broadcast %18 : vector<32x1xf32> to vector<32x512xf32>
    %20 = arith.addf %17, %19 : vector<32x512xf32>
    %cst_5 = arith.constant 0.000000e+00 : f32
    %21 = vector.broadcast %cst_5 : f32 to vector<32x512xf32>
    %22 = arith.maximumf %20, %21 : vector<32x512xf32>
    %c0_6 = arith.constant 0 : index
    %c0_7 = arith.constant 0 : index
    %23 = vector.load %arg4[%c0_6, %c0_7] : memref<128x32xbf16, #tpu.memory_space<vmem>>, vector<128x32xbf16>
    %24 = arith.truncf %22 : vector<32x512xf32> to vector<32x512xbf16>
    %cst_8 = arith.constant dense<0.000000e+00> : vector<128x512xf32>
    %25 = tpu.matmul %23, %24, %cst_8 {dimension_numbers = #tpu.dot_dimension_numbers<[1], [0], [0], [1], [0, 0, 1, 1], [], []>} : vector<128x32xbf16>, vector<32x512xbf16>, vector<128x512xf32> -> vector<128x512xf32>
    %c0_9 = arith.constant 0 : index
    %c0_10 = arith.constant 0 : index
    %26 = vector.load %arg5[%c0_9, %c0_10] : memref<128x1xf32, #tpu.memory_space<vmem>>, vector<128x1xf32>
    %27 = vector.broadcast %26 : vector<128x1xf32> to vector<128x512xf32>
    %28 = arith.addf %25, %27 : vector<128x512xf32>
    %cst_11 = arith.constant 0.000000e+00 : f32
    %29 = vector.broadcast %cst_11 : f32 to vector<128x512xf32>
    %30 = arith.maximumf %28, %29 : vector<128x512xf32>
    %c0_12 = arith.constant 0 : index
    %c0_13 = arith.constant 0 : index
    %31 = vector.load %arg6[%c0_12, %c0_13] : memref<64x128xbf16, #tpu.memory_space<vmem>>, vector<64x128xbf16>
    %32 = arith.truncf %30 : vector<128x512xf32> to vector<128x512xbf16>
    %cst_14 = arith.constant dense<0.000000e+00> : vector<64x512xf32>
    %33 = tpu.matmul %31, %32, %cst_14 {dimension_numbers = #tpu.dot_dimension_numbers<[1], [0], [0], [1], [0, 0, 1, 1], [], []>} : vector<64x128xbf16>, vector<128x512xbf16>, vector<64x512xf32> -> vector<64x512xf32>
    %c0_15 = arith.constant 0 : index
    %c0_16 = arith.constant 0 : index
    %34 = vector.load %arg7[%c0_15, %c0_16] : memref<64x1xf32, #tpu.memory_space<vmem>>, vector<64x1xf32>
    %35 = vector.broadcast %34 : vector<64x1xf32> to vector<64x512xf32>
    %36 = arith.addf %33, %35 : vector<64x512xf32>
    %37 = arith.truncf %36 : vector<64x512xf32> to vector<64x512xbf16>
    %c0_17 = arith.constant 0 : index
    %c0_18 = arith.constant 0 : index
    %38 = vector.load %arg8[%c0_17, %c0_18] : memref<64x512xbf16, #tpu.memory_space<vmem>>, vector<64x512xbf16>
    tpu.vector_store %arg8[%c0_17, %c0_18], %37 {strides = array<i32>} : memref<64x512xbf16, #tpu.memory_space<vmem>>, vector<64x512xbf16>,
    return
  }
  func.func @transform_0(%arg0: i32) -> (i32, i32) {
    %c0_i32 = arith.constant 0 : i32
    %c0_i32_0 = arith.constant 0 : i32
    return %c0_i32, %arg0 : i32, i32
  }
  func.func @transform_1(%arg0: i32) -> (i32, i32) {
    %c0_i32 = arith.constant 0 : i32
    %c0_i32_0 = arith.constant 0 : i32
    %c0_i32_1 = arith.constant 0 : i32
    return %c0_i32, %c0_i32_0 : i32, i32
  }
  func.func @transform_2(%arg0: i32) -> (i32, i32) {
    %c0_i32 = arith.constant 0 : i32
    %c0_i32_0 = arith.constant 0 : i32
    %c0_i32_1 = arith.constant 0 : i32
    return %c0_i32, %c0_i32_0 : i32, i32
  }
  func.func @transform_3(%arg0: i32) -> (i32, i32) {
    %c0_i32 = arith.constant 0 : i32
    %c0_i32_0 = arith.constant 0 : i32
    %c0_i32_1 = arith.constant 0 : i32
    return %c0_i32, %c0_i32_0 : i32, i32
  }
  func.func @transform_4(%arg0: i32) -> (i32, i32) {
    %c0_i32 = arith.constant 0 : i32
    %c0_i32_0 = arith.constant 0 : i32
    %c0_i32_1 = arith.constant 0 : i32
    return %c0_i32, %c0_i32_0 : i32, i32
  }
  func.func @transform_5(%arg0: i32) -> (i32, i32) {
    %c0_i32 = arith.constant 0 : i32
    %c0_i32_0 = arith.constant 0 : i32
    %c0_i32_1 = arith.constant 0 : i32
    return %c0_i32, %c0_i32_0 : i32, i32
  }
  func.func @transform_6(%arg0: i32) -> (i32, i32) {
    %c0_i32 = arith.constant 0 : i32
    %c0_i32_0 = arith.constant 0 : i32
    %c0_i32_1 = arith.constant 0 : i32
    return %c0_i32, %c0_i32_0 : i32, i32
  }
  func.func @transform_7(%arg0: i32) -> (i32, i32) {
    %c0_i32 = arith.constant 0 : i32
    %c0_i32_0 = arith.constant 0 : i32
    return %c0_i32, %arg0 : i32, i32
  }
}

</mosaic_0001>

<bundles_post_ra>
// kernel: tile.13
= control target key start
LH: loop header
LB: loop body
LE: loop exit
PB: predicated region body
PF: predicated region fallthrough
CT: control target
= control target key end

     0   :  { %s22_s0 = inlined_call_operand.vmem [shape: f32[16], index: 0, kind: input, shape index: {}]   ;;  %s23_s1 = inlined_call_operand.vmem [shape: f32[8,16], index: 1, kind: output, shape index: {}]  }
   0x1   :  { %v4_v0 = vld [vmem:[%s22_s0] ss:$0 sm:$0xff] }
   0x2   :  { %5 = vst [vmem:[%s23_s1] sm:$0xff] %v4_v0 }

// kernel: tile.0
= control target key start
LH: loop header
LB: loop body
LE: loop exit
PB: predicated region body
PF: predicated region fallthrough
CT: control target
= control target key end

     0   :  { %vm3_vm0 = vcmask 7168   ;;  %s264_s8 = smov 125   ;;  %s265_s17 = smov 126   ;;  %s547_s0 = inlined_call_operand.vmem [shape: f32[8,16], index: 0, kind: input, shape index: {}]   ;;  %s548_s1 = inlined_call_operand.vmem [shape: f32[128,1], index: 1, kind: output, shape index: {}]  }
   0x1   :  { %v8_v0 = vld [vmem:[%s547_s0] sm:$0xff]   ;;  %s263_s0 = smov 127   ;;  %s266_s18 = smov 124  }
   0x2   :  { %9 = vrot.lane.b32.xlu0 %v8_v0, %s263_s0  ;;  %33 = vrot.lane.b32.xlu1 %v8_v0, %s264_s8  ;;  %4 = vst.msk [vmem:[%s548_s1] ss:$16 sm:$0x3] %vm3_vm0, %v8_v0   ;;  %5 = vst.msk [vmem:[%s548_s1] ss:$16 sm:$0xc] %vm3_vm0, %v8_v0  }
   0x3   :  { %6 = vst.msk [vmem:[%s548_s1] ss:$16 sm:$0x30] %vm3_vm0, %v8_v0   ;;  %7 = vst.msk [vmem:[%s548_s1] ss:$16 sm:$0xc0] %vm3_vm0, %v8_v0  }
   0x4   :  { %s267_s19 = smov 123   ;;  %s268_s20 = smov 122  }
   0x5   :  { %s269_s21 = smov 121   ;;  %s270_s22 = smov 120  }
   0x6   :  { %21 = vrot.lane.b32.xlu0 %v8_v0, %s265_s17  ;;  %45 = vrot.lane.b32.xlu1 %v8_v0, %s266_s18  ;;  %s271_s23 = smov 119   ;;  %s272_s24 = smov 118  }
   0x7   :  { %s273_s25 = smov 117   ;;  %s274_s26 = smov 116  }
   0x8   :  { %s275_s27 = smov 115   ;;  %s276_s28 = smov 114  }
   0x9   :  { %s277_s29 = smov 113  }
   0xa   :  { %57 = vrot.lane.b32.xlu0 %v8_v0, %s267_s19  ;;  %69 = vrot.lane.b32.xlu1 %v8_v0, %s268_s20 }
   0xe   :  { %81 = vrot.lane.b32.xlu0 %v8_v0, %s269_s21  ;;  %93 = vrot.lane.b32.xlu1 %v8_v0, %s270_s22 }
  0x12   :  { %105 = vrot.lane.b32.xlu0 %v8_v0, %s271_s23  ;;  %117 = vrot.lane.b32.xlu1 %v8_v0, %s272_s24 }
  0x16   :  { %129 = vrot.lane.b32.xlu0 %v8_v0, %s273_s25  ;;  %141 = vrot.lane.b32.xlu1 %v8_v0, %s274_s26 }
  0x1a   :  { %153 = vrot.lane.b32.xlu0 %v8_v0, %s275_s27  ;;  %165 = vrot.lane.b32.xlu1 %v8_v0, %s276_s28 }
  0x1e   :  { %177 = vrot.lane.b32.xlu0 %v8_v0, %s277_s29 }
  0x74   :  { %v10_v1 = vpop.permute.xlu0 %9   ;;  %v34_v2 = vpop.permute.xlu1 %33  }
  0x75   :  { %188 = vst.msk [vmem:[%s548_s1 + $0x1] ss:$16 sm:$0x3] %vm3_vm0, %v10_v1   ;;  %189 = vst.msk [vmem:[%s548_s1 + $0x1] ss:$16 sm:$0xc] %vm3_vm0, %v10_v1  }
  0x76   :  { %190 = vst.msk [vmem:[%s548_s1 + $0x1] ss:$16 sm:$0x30] %vm3_vm0, %v10_v1   ;;  %191 = vst.msk [vmem:[%s548_s1 + $0x1] ss:$16 sm:$0xc0] %vm3_vm0, %v10_v1  }
  0x77   :  { %196 = vst.msk [vmem:[%s548_s1 + $0x3] ss:$16 sm:$0x3] %vm3_vm0, %v34_v2   ;;  %197 = vst.msk [vmem:[%s548_s1 + $0x3] ss:$16 sm:$0xc] %vm3_vm0, %v34_v2  }
  0x78   :  { %198 = vst.msk [vmem:[%s548_s1 + $0x3] ss:$16 sm:$0x30] %vm3_vm0, %v34_v2   ;;  %199 = vst.msk [vmem:[%s548_s1 + $0x3] ss:$16 sm:$0xc0] %vm3_vm0, %v34_v2   ;;  %v22_v3 = vpop.permute.xlu0 %21   ;;  %v46_v4 = vpop.permute.xlu1 %45  }
  0x79   :  { %192 = vst.msk [vmem:[%s548_s1 + $0x2] ss:$16 sm:$0x3] %vm3_vm0, %v22_v3   ;;  %193 = vst.msk [vmem:[%s548_s1 + $0x2] ss:$16 sm:$0xc] %vm3_vm0, %v22_v3  }
  0x7a   :  { %194 = vst.msk [vmem:[%s548_s1 + $0x2] ss:$16 sm:$0x30] %vm3_vm0, %v22_v3   ;;  %195 = vst.msk [vmem:[%s548_s1 + $0x2] ss:$16 sm:$0xc0] %vm3_vm0, %v22_v3  }
  0x7b   :  { %200 = vst.msk [vmem:[%s548_s1 + $0x4] ss:$16 sm:$0x3] %vm3_vm0, %v46_v4   ;;  %201 = vst.msk [vmem:[%s548_s1 + $0x4] ss:$16 sm:$0xc] %vm3_vm0, %v46_v4  }
  0x7c   :  { %202 = vst.msk [vmem:[%s548_s1 + $0x4] ss:$16 sm:$0x30] %vm3_vm0, %v46_v4   ;;  %203 = vst.msk [vmem:[%s548_s1 + $0x4] ss:$16 sm:$0xc0] %vm3_vm0, %v46_v4   ;;  %v58_v5 = vpop.permute.xlu0 %57   ;;  %v70_v6 = vpop.permute.xlu1 %69  }
  0x7d   :  { %204 = vst.msk [vmem:[%s548_s1 + $0x5] ss:$16 sm:$0x3] %vm3_vm0, %v58_v5   ;;  %205 = vst.msk [vmem:[%s548_s1 + $0x5] ss:$16 sm:$0xc] %vm3_vm0, %v58_v5  }
  0x7e   :  { %206 = vst.msk [vmem:[%s548_s1 + $0x5] ss:$16 sm:$0x30] %vm3_vm0, %v58_v5   ;;  %207 = vst.msk [vmem:[%s548_s1 + $0x5] ss:$16 sm:$0xc0] %vm3_vm0, %v58_v5  }
  0x7f   :  { %208 = vst.msk [vmem:[%s548_s1 + $0x6] ss:$16 sm:$0x3] %vm3_vm0, %v70_v6   ;;  %209 = vst.msk [vmem:[%s548_s1 + $0x6] ss:$16 sm:$0xc] %vm3_vm0, %v70_v6  }
  0x80   :  { %210 = vst.msk [vmem:[%s548_s1 + $0x6] ss:$16 sm:$0x30] %vm3_vm0, %v70_v6   ;;  %211 = vst.msk [vmem:[%s548_s1 + $0x6] ss:$16 sm:$0xc0] %vm3_vm0, %v70_v6   ;;  %v82_v7 = vpop.permute.xlu0 %81   ;;  %v94_v8 = vpop.permute.xlu1 %93  }
  0x81   :  { %212 = vst.msk [vmem:[%s548_s1 + $0x7] ss:$16 sm:$0x3] %vm3_vm0, %v82_v7   ;;  %213 = vst.msk [vmem:[%s548_s1 + $0x7] ss:$16 sm:$0xc] %vm3_vm0, %v82_v7  }
  0x82   :  { %214 = vst.msk [vmem:[%s548_s1 + $0x7] ss:$16 sm:$0x30] %vm3_vm0, %v82_v7   ;;  %215 = vst.msk [vmem:[%s548_s1 + $0x7] ss:$16 sm:$0xc0] %vm3_vm0, %v82_v7  }
  0x83   :  { %216 = vst.msk [vmem:[%s548_s1 + $0x8] ss:$16 sm:$0x3] %vm3_vm0, %v94_v8   ;;  %217 = vst.msk [vmem:[%s548_s1 + $0x8] ss:$16 sm:$0xc] %vm3_vm0, %v94_v8  }
  0x84   :  { %218 = vst.msk [vmem:[%s548_s1 + $0x8] ss:$16 sm:$0x30] %vm3_vm0, %v94_v8   ;;  %219 = vst.msk [vmem:[%s548_s1 + $0x8] ss:$16 sm:$0xc0] %vm3_vm0, %v94_v8   ;;  %v106_v9 = vpop.permute.xlu0 %105   ;;  %v118_v10 = vpop.permute.xlu1 %117  }
  0x85   :  { %220 = vst.msk [vmem:[%s548_s1 + $0x9] ss:$16 sm:$0x3] %vm3_vm0, %v106_v9   ;;  %221 = vst.msk [vmem:[%s548_s1 + $0x9] ss:$16 sm:$0xc] %vm3_vm0, %v106_v9  }
  0x86   :  { %222 = vst.msk [vmem:[%s548_s1 + $0x9] ss:$16 sm:$0x30] %vm3_vm0, %v106_v9   ;;  %223 = vst.msk [vmem:[%s548_s1 + $0x9] ss:$16 sm:$0xc0] %vm3_vm0, %v106_v9  }
  0x87   :  { %224 = vst.msk [vmem:[%s548_s1 + $0xa] ss:$16 sm:$0x3] %vm3_vm0, %v118_v10   ;;  %225 = vst.msk [vmem:[%s548_s1 + $0xa] ss:$16 sm:$0xc] %vm3_vm0, %v118_v10  }
  0x88   :  { %226 = vst.msk [vmem:[%s548_s1 + $0xa] ss:$16 sm:$0x30] %vm3_vm0, %v118_v10   ;;  %227 = vst.msk [vmem:[%s548_s1 + $0xa] ss:$16 sm:$0xc0] %vm3_vm0, %v118_v10   ;;  %v130_v11 = vpop.permute.xlu0 %129   ;;  %v142_v12 = vpop.permute.xlu1 %141  }
  0x89   :  { %228 = vst.msk [vmem:[%s548_s1 + $0xb] ss:$16 sm:$0x3] %vm3_vm0, %v130_v11   ;;  %229 = vst.msk [vmem:[%s548_s1 + $0xb] ss:$16 sm:$0xc] %vm3_vm0, %v130_v11  }
  0x8a   :  { %230 = vst.msk [vmem:[%s548_s1 + $0xb] ss:$16 sm:$0x30] %vm3_vm0, %v130_v11   ;;  %231 = vst.msk [vmem:[%s548_s1 + $0xb] ss:$16 sm:$0xc0] %vm3_vm0, %v130_v11  }
  0x8b   :  { %232 = vst.msk [vmem:[%s548_s1 + $0xc] ss:$16 sm:$0x3] %vm3_vm0, %v142_v12   ;;  %233 = vst.msk [vmem:[%s548_s1 + $0xc] ss:$16 sm:$0xc] %vm3_vm0, %v142_v12  }
  0x8c   :  { %234 = vst.msk [vmem:[%s548_s1 + $0xc] ss:$16 sm:$0x30] %vm3_vm0, %v142_v12   ;;  %235 = vst.msk [vmem:[%s548_s1 + $0xc] ss:$16 sm:$0xc0] %vm3_vm0, %v142_v12   ;;  %v154_v13 = vpop.permute.xlu0 %153   ;;  %v166_v14 = vpop.permute.xlu1 %165  }
  0x8d   :  { %236 = vst.msk [vmem:[%s548_s1 + $0xd] ss:$16 sm:$0x3] %vm3_vm0, %v154_v13   ;;  %237 = vst.msk [vmem:[%s548_s1 + $0xd] ss:$16 sm:$0xc] %vm3_vm0, %v154_v13  }
  0x8e   :  { %238 = vst.msk [vmem:[%s548_s1 + $0xd] ss:$16 sm:$0x30] %vm3_vm0, %v154_v13   ;;  %239 = vst.msk [vmem:[%s548_s1 + $0xd] ss:$16 sm:$0xc0] %vm3_vm0, %v154_v13  }
  0x8f   :  { %240 = vst.msk [vmem:[%s548_s1 + $0xe] ss:$16 sm:$0x3] %vm3_vm0, %v166_v14   ;;  %241 = vst.msk [vmem:[%s548_s1 + $0xe] ss:$16 sm:$0xc] %vm3_vm0, %v166_v14  }
  0x90   :  { %242 = vst.msk [vmem:[%s548_s1 + $0xe] ss:$16 sm:$0x30] %vm3_vm0, %v166_v14   ;;  %243 = vst.msk [vmem:[%s548_s1 + $0xe] ss:$16 sm:$0xc0] %vm3_vm0, %v166_v14   ;;  %v178_v15 = vpop.permute.xlu0 %177  }
  0x91   :  { %244 = vst.msk [vmem:[%s548_s1 + $0xf] ss:$16 sm:$0x3] %vm3_vm0, %v178_v15   ;;  %245 = vst.msk [vmem:[%s548_s1 + $0xf] ss:$16 sm:$0xc] %vm3_vm0, %v178_v15  }
  0x92   :  { %246 = vst.msk [vmem:[%s548_s1 + $0xf] ss:$16 sm:$0x30] %vm3_vm0, %v178_v15   ;;  %247 = vst.msk [vmem:[%s548_s1 + $0xf] ss:$16 sm:$0xc0] %vm3_vm0, %v178_v15  }

// kernel: tile.18
= control target key start
LH: loop header
LB: loop body
LE: loop exit
PB: predicated region body
PF: predicated region fallthrough
CT: control target
= control target key end

     0   :  { %s22_s0 = inlined_call_operand.vmem [shape: f32[8], index: 0, kind: input, shape index: {}]   ;;  %s23_s1 = inlined_call_operand.vmem [shape: f32[8,8], index: 1, kind: output, shape index: {}]  }
   0x1   :  { %v4_v0 = vld [vmem:[%s22_s0] ss:$0 sm:$0xff] }
   0x2   :  { %5 = vst [vmem:[%s23_s1] sm:$0xff] %v4_v0 }

// kernel: tile.1
= control target key start
LH: loop header
LB: loop body
LE: loop exit
PB: predicated region body
PF: predicated region fallthrough
CT: control target
= control target key end

     0   :  { %vm3_vm0 = vcmask 7168   ;;  %s84_s8 = smov 125   ;;  %s85_s13 = smov 126   ;;  %s167_s0 = inlined_call_operand.vmem [shape: f32[8,8], index: 0, kind: input, shape index: {}]   ;;  %s168_s1 = inlined_call_operand.vmem [shape: f32[64,1], index: 1, kind: output, shape index: {}]  }
   0x1   :  { %v6_v0 = vld [vmem:[%s167_s0] sm:$0xff]   ;;  %s83_s0 = smov 127   ;;  %s86_s14 = smov 124  }
   0x2   :  { %7 = vrot.lane.b32.xlu0 %v6_v0, %s83_s0  ;;  %23 = vrot.lane.b32.xlu1 %v6_v0, %s84_s8  ;;  %4 = vst.msk [vmem:[%s168_s1] ss:$8 sm:$0xf] %vm3_vm0, %v6_v0   ;;  %5 = vst.msk [vmem:[%s168_s1] ss:$8 sm:$0xf0] %vm3_vm0, %v6_v0  }
   0x3   :  { %s87_s15 = smov 123   ;;  %s88_s16 = smov 122  }
   0x4   :  { %s89_s17 = smov 121  }
   0x6   :  { %15 = vrot.lane.b32.xlu0 %v6_v0, %s85_s13  ;;  %31 = vrot.lane.b32.xlu1 %v6_v0, %s86_s14 }
   0xa   :  { %39 = vrot.lane.b32.xlu0 %v6_v0, %s87_s15  ;;  %47 = vrot.lane.b32.xlu1 %v6_v0, %s88_s16 }
   0xe   :  { %55 = vrot.lane.b32.xlu0 %v6_v0, %s89_s17 }
  0x74   :  { %v8_v1 = vpop.permute.xlu0 %7   ;;  %v24_v2 = vpop.permute.xlu1 %23  }
  0x75   :  { %62 = vst.msk [vmem:[%s168_s1 + $0x1] ss:$8 sm:$0xf] %vm3_vm0, %v8_v1   ;;  %63 = vst.msk [vmem:[%s168_s1 + $0x1] ss:$8 sm:$0xf0] %vm3_vm0, %v8_v1  }
  0x76   :  { %66 = vst.msk [vmem:[%s168_s1 + $0x3] ss:$8 sm:$0xf] %vm3_vm0, %v24_v2   ;;  %67 = vst.msk [vmem:[%s168_s1 + $0x3] ss:$8 sm:$0xf0] %vm3_vm0, %v24_v2  }
  0x78   :  { %v16_v3 = vpop.permute.xlu0 %15   ;;  %v32_v4 = vpop.permute.xlu1 %31  }
  0x79   :  { %64 = vst.msk [vmem:[%s168_s1 + $0x2] ss:$8 sm:$0xf] %vm3_vm0, %v16_v3   ;;  %65 = vst.msk [vmem:[%s168_s1 + $0x2] ss:$8 sm:$0xf0] %vm3_vm0, %v16_v3  }
  0x7a   :  { %68 = vst.msk [vmem:[%s168_s1 + $0x4] ss:$8 sm:$0xf] %vm3_vm0, %v32_v4   ;;  %69 = vst.msk [vmem:[%s168_s1 + $0x4] ss:$8 sm:$0xf0] %vm3_vm0, %v32_v4  }
  0x7c   :  { %v40_v5 = vpop.permute.xlu0 %39   ;;  %v48_v6 = vpop.permute.xlu1 %47  }
  0x7d   :  { %70 = vst.msk [vmem:[%s168_s1 + $0x5] ss:$8 sm:$0xf] %vm3_vm0, %v40_v5   ;;  %71 = vst.msk [vmem:[%s168_s1 + $0x5] ss:$8 sm:$0xf0] %vm3_vm0, %v40_v5  }
  0x7e   :  { %72 = vst.msk [vmem:[%s168_s1 + $0x6] ss:$8 sm:$0xf] %vm3_vm0, %v48_v6   ;;  %73 = vst.msk [vmem:[%s168_s1 + $0x6] ss:$8 sm:$0xf0] %vm3_vm0, %v48_v6  }
  0x80   :  { %v56_v7 = vpop.permute.xlu0 %55  }
  0x81   :  { %74 = vst.msk [vmem:[%s168_s1 + $0x7] ss:$8 sm:$0xf] %vm3_vm0, %v56_v7   ;;  %75 = vst.msk [vmem:[%s168_s1 + $0x7] ss:$8 sm:$0xf0] %vm3_vm0, %v56_v7  }

// kernel: unet3d_forward.1
= control target key start
LH: loop header
LB: loop body
LE: loop exit
PB: predicated region body
PF: predicated region fallthrough
CT: control target
= control target key end

     0   :  { %s2931_s24 = smov 0   ;;  %s2933_s25 = smov 0   ;;  %s3617_s0 = inlined_call_operand.vmem [shape: bf16[256,1024], index: 0, kind: input, shape index: {}]   ;;  %s3618_s1 = inlined_call_operand.vmem [shape: bf16[256,256], index: 1, kind: input, shape index: {}]   ;;  %s3619_s2 = inlined_call_operand.vmem [shape: f32[32,1], index: 2, kind: input, shape index: {}]   ;;  %s3620_s3 = inlined_call_operand.vmem [shape: bf16[128,32], index: 3, kind: input, shape index: {}]   ;;  %s3621_s4 = inlined_call_operand.vmem [shape: f32[128,1], index: 4, kind: input, shape index: {}]   ;;  %s3622_s5 = inlined_call_operand.vmem [shape: bf16[64,128], index: 5, kind: input, shape index: {}]   ;;  %s3623_s6 = inlined_call_operand.vmem [shape: f32[64,1], index: 6, kind: input, shape index: {}]   ;;  %s3624_s7 = inlined_call_operand.vmem [shape: bf16[64,1024], index: 7, kind: output, shape index: {}]  }
   0x1   :  { %s2935_s26 = smov 0  }
   0x2 LB: > { %s2510_s27 = sadd.s32 4294967295, %s2888_s26   ;;  %s2948_s28 = sadd.s32 1, %s2888_s26   ;;  %s2888_s26 = sphi %s2935_s26, %s3628_s26   ;;  %s2884_s25 = sphi %s2933_s25, %s3627_s25   ;;  %s2880_s24 = sphi %s2931_s24, %s3626_s24  }
   0x3   : > { %s21_s29 = ssub.s32 %s2888_s26, %s2948_s28  ;;  %s24_s30 = sadd.s32 1, %s2884_s25 }
   0x4   : > { %p22_p0 = scmp.eq.s32.totalorder %s21_s29, 0  ;;  %p31_p1 = scmp.ne.s32.totalorder %s2884_s25, %s2880_s24 }
   0x5   : > { %p32_p2 = scmp.eq.s32.totalorder %s2888_s26, 0  ;;  %p187_p3 = scmp.eq.s32.totalorder %s2510_s27, 1 }
   0x6   : > { %s2959_s8 = scalar_select %p22_p0, %s2884_s25, %s24_s30  }
   0x7   : > { %p33_p4 = por %p32_p2, %p31_p1  ;;  %p2961_p5 = por %p187_p3, %p31_p1 }
   0x8   : > { %p2513_p6 = scmp.ge.s32.totalorder %s2888_s26, 2 }
   0xa   : > { %227 = sbr.rel (%p2513_p6) target bundleno = 53 (0x35), region = 40 }
  0x11   : > { %230 = sbr.rel (!%p33_p4) target bundleno = 53 (0x35), region = 44  ;;  %s232_s10 = sand.u32 (%p33_p4), 1, %s2884_s25  }
  0x12   : > { %s2665_s11 = sshll.u32 (%p33_p4), %s2888_s26, 4  ;;  %s2514_s12 = sshll.u32 (%p33_p4), %s232_s10, 9 }
  0x13   : > { %s2971_s15 = scalar_lea.vmem (%p33_p4), %s3617_s0, %s2665_s11  ;;  %s2976_s16 = scalar_lea.vmem (%p33_p4), [#allocation2], %s2514_s12 }
  0x14   : > { %v250_v0 = vld [vmem:[%s2971_s15] sm:$0xff] (%p33_p4)  ;;  %v252_v1 = vld [vmem:[%s2971_s15 + $0x8] sm:$0xff] (%p33_p4) }
  0x15   : > { %v254_v2 = vld [vmem:[%s2971_s15 + $0x20] sm:$0xff] (%p33_p4)  ;;  %251 = vst [vmem:[%s2976_s16] sm:$0xff] (%p33_p4), %v250_v0  ;;  %253 = vst [vmem:[%s2976_s16 + $0x8] sm:$0xff] (%p33_p4), %v252_v1  ;;  %v256_v3 = vld [vmem:[%s2971_s15 + $0x28] sm:$0xff] (%p33_p4) }
  0x16   : > { %255 = vst [vmem:[%s2976_s16 + $0x10] sm:$0xff] (%p33_p4), %v254_v2  ;;  %v258_v4 = vld [vmem:[%s2971_s15 + $0x40] sm:$0xff] (%p33_p4)  ;;  %v260_v5 = vld [vmem:[%s2971_s15 + $0x48] sm:$0xff] (%p33_p4)  ;;  %257 = vst [vmem:[%s2976_s16 + $0x18] sm:$0xff] (%p33_p4), %v256_v3 }
  0x17   : > { %259 = vst [vmem:[%s2976_s16 + $0x20] sm:$0xff] (%p33_p4), %v258_v4  ;;  %261 = vst [vmem:[%s2976_s16 + $0x28] sm:$0xff] (%p33_p4), %v260_v5  ;;  %v262_v6 = vld [vmem:[%s2971_s15 + $0x60] sm:$0xff] (%p33_p4)  ;;  %v264_v7 = vld [vmem:[%s2971_s15 + $0x68] sm:$0xff] (%p33_p4) }
  0x18   : > { %v266_v8 = vld [vmem:[%s2971_s15 + $0x80] sm:$0xff]  ;;  %263 = vst [vmem:[%s2976_s16 + $0x30] sm:$0xff] %v262_v6  ;;  %265 = vst [vmem:[%s2976_s16 + $0x38] sm:$0xff] %v264_v7  ;;  %v268_v9 = vld [vmem:[%s2971_s15 + $0x88] sm:$0xff] }
  0x19   : > { %267 = vst [vmem:[%s2976_s16 + $0x40] sm:$0xff] %v266_v8  ;;  %v270_v10 = vld [vmem:[%s2971_s15 + $0xa0] sm:$0xff]  ;;  %v272_v11 = vld [vmem:[%s2971_s15 + $0xa8] sm:$0xff]  ;;  %269 = vst [vmem:[%s2976_s16 + $0x48] sm:$0xff] %v268_v9 }
  0x1a   : > { %271 = vst [vmem:[%s2976_s16 + $0x50] sm:$0xff] %v270_v10  ;;  %273 = vst [vmem:[%s2976_s16 + $0x58] sm:$0xff] %v272_v11  ;;  %v274_v12 = vld [vmem:[%s2971_s15 + $0xc0] sm:$0xff]  ;;  %v276_v13 = vld [vmem:[%s2971_s15 + $0xc8] sm:$0xff] }
  0x1b   : > { %v278_v14 = vld [vmem:[%s2971_s15 + $0xe0] sm:$0xff]  ;;  %275 = vst [vmem:[%s2976_s16 + $0x60] sm:$0xff] %v274_v12  ;;  %277 = vst [vmem:[%s2976_s16 + $0x68] sm:$0xff] %v276_v13  ;;  %v280_v15 = vld [vmem:[%s2971_s15 + $0xe8] sm:$0xff] }
  0x1c   : > { %279 = vst [vmem:[%s2976_s16 + $0x70] sm:$0xff] %v278_v14  ;;  %v282_v16 = vld [vmem:[%s2971_s15 + $0x100] sm:$0xff]  ;;  %v284_v17 = vld [vmem:[%s2971_s15 + $0x108] sm:$0xff]  ;;  %281 = vst [vmem:[%s2976_s16 + $0x78] sm:$0xff] %v280_v15 }
  0x1d   : > { %283 = vst [vmem:[%s2976_s16 + $0x80] sm:$0xff] %v282_v16  ;;  %285 = vst [vmem:[%s2976_s16 + $0x88] sm:$0xff] %v284_v17  ;;  %v286_v18 = vld [vmem:[%s2971_s15 + $0x120] sm:$0xff]  ;;  %v288_v19 = vld [vmem:[%s2971_s15 + $0x128] sm:$0xff] }
  0x1e   : > { %v290_v20 = vld [vmem:[%s2971_s15 + $0x140] sm:$0xff]  ;;  %287 = vst [vmem:[%s2976_s16 + $0x90] sm:$0xff] %v286_v18  ;;  %289 = vst [vmem:[%s2976_s16 + $0x98] sm:$0xff] %v288_v19  ;;  %v292_v21 = vld [vmem:[%s2971_s15 + $0x148] sm:$0xff] }
  0x1f   : > { %291 = vst [vmem:[%s2976_s16 + $0xa0] sm:$0xff] %v290_v20  ;;  %v294_v22 = vld [vmem:[%s2971_s15 + $0x160] sm:$0xff]  ;;  %v296_v23 = vld [vmem:[%s2971_s15 + $0x168] sm:$0xff]  ;;  %293 = vst [vmem:[%s2976_s16 + $0xa8] sm:$0xff] %v292_v21 }
  0x20   : > { %295 = vst [vmem:[%s2976_s16 + $0xb0] sm:$0xff] %v294_v22  ;;  %297 = vst [vmem:[%s2976_s16 + $0xb8] sm:$0xff] %v296_v23  ;;  %v298_v24 = vld [vmem:[%s2971_s15 + $0x180] sm:$0xff]  ;;  %v300_v25 = vld [vmem:[%s2971_s15 + $0x188] sm:$0xff] }
  0x21   : > { %v302_v26 = vld [vmem:[%s2971_s15 + $0x1a0] sm:$0xff]  ;;  %299 = vst [vmem:[%s2976_s16 + $0xc0] sm:$0xff] %v298_v24  ;;  %301 = vst [vmem:[%s2976_s16 + $0xc8] sm:$0xff] %v300_v25  ;;  %v304_v27 = vld [vmem:[%s2971_s15 + $0x1a8] sm:$0xff] }
  0x22   : > { %303 = vst [vmem:[%s2976_s16 + $0xd0] sm:$0xff] %v302_v26  ;;  %v306_v28 = vld [vmem:[%s2971_s15 + $0x1c0] sm:$0xff]  ;;  %v308_v29 = vld [vmem:[%s2971_s15 + $0x1c8] sm:$0xff]  ;;  %305 = vst [vmem:[%s2976_s16 + $0xd8] sm:$0xff] %v304_v27 }
  0x23   : > { %307 = vst [vmem:[%s2976_s16 + $0xe0] sm:$0xff] %v306_v28  ;;  %309 = vst [vmem:[%s2976_s16 + $0xe8] sm:$0xff] %v308_v29  ;;  %v310_v30 = vld [vmem:[%s2971_s15 + $0x1e0] sm:$0xff]  ;;  %v312_v31 = vld [vmem:[%s2971_s15 + $0x1e8] sm:$0xff] }
  0x24   : > { %v314_v32 = vld [vmem:[%s2971_s15 + $0x200] sm:$0xff]  ;;  %311 = vst [vmem:[%s2976_s16 + $0xf0] sm:$0xff] %v310_v30  ;;  %313 = vst [vmem:[%s2976_s16 + $0xf8] sm:$0xff] %v312_v31  ;;  %v316_v33 = vld [vmem:[%s2971_s15 + $0x208] sm:$0xff] }
  0x25   : > { %315 = vst [vmem:[%s2976_s16 + $0x100] sm:$0xff] %v314_v32  ;;  %v318_v34 = vld [vmem:[%s2971_s15 + $0x220] sm:$0xff]  ;;  %v320_v35 = vld [vmem:[%s2971_s15 + $0x228] sm:$0xff]  ;;  %317 = vst [vmem:[%s2976_s16 + $0x108] sm:$0xff] %v316_v33 }
  0x26   : > { %319 = vst [vmem:[%s2976_s16 + $0x110] sm:$0xff] %v318_v34  ;;  %321 = vst [vmem:[%s2976_s16 + $0x118] sm:$0xff] %v320_v35  ;;  %v322_v36 = vld [vmem:[%s2971_s15 + $0x240] sm:$0xff]  ;;  %v324_v37 = vld [vmem:[%s2971_s15 + $0x248] sm:$0xff] }
  0x27   : > { %v326_v38 = vld [vmem:[%s2971_s15 + $0x260] sm:$0xff]  ;;  %323 = vst [vmem:[%s2976_s16 + $0x120] sm:$0xff] %v322_v36  ;;  %325 = vst [vmem:[%s2976_s16 + $0x128] sm:$0xff] %v324_v37  ;;  %v328_v39 = vld [vmem:[%s2971_s15 + $0x268] sm:$0xff] }
  0x28   : > { %327 = vst [vmem:[%s2976_s16 + $0x130] sm:$0xff] %v326_v38  ;;  %v330_v40 = vld [vmem:[%s2971_s15 + $0x280] sm:$0xff]  ;;  %v332_v41 = vld [vmem:[%s2971_s15 + $0x288] sm:$0xff]  ;;  %329 = vst [vmem:[%s2976_s16 + $0x138] sm:$0xff] %v328_v39 }
  0x29   : > { %331 = vst [vmem:[%s2976_s16 + $0x140] sm:$0xff] %v330_v40  ;;  %333 = vst [vmem:[%s2976_s16 + $0x148] sm:$0xff] %v332_v41  ;;  %v334_v42 = vld [vmem:[%s2971_s15 + $0x2a0] sm:$0xff]  ;;  %v336_v43 = vld [vmem:[%s2971_s15 + $0x2a8] sm:$0xff] }
  0x2a   : > { %v338_v44 = vld [vmem:[%s2971_s15 + $0x2c0] sm:$0xff]  ;;  %335 = vst [vmem:[%s2976_s16 + $0x150] sm:$0xff] %v334_v42  ;;  %337 = vst [vmem:[%s2976_s16 + $0x158] sm:$0xff] %v336_v43  ;;  %v340_v45 = vld [vmem:[%s2971_s15 + $0x2c8] sm:$0xff] }
  0x2b   : > { %339 = vst [vmem:[%s2976_s16 + $0x160] sm:$0xff] %v338_v44  ;;  %v342_v46 = vld [vmem:[%s2971_s15 + $0x2e0] sm:$0xff]  ;;  %v344_v47 = vld [vmem:[%s2971_s15 + $0x2e8] sm:$0xff]  ;;  %341 = vst [vmem:[%s2976_s16 + $0x168] sm:$0xff] %v340_v45 }
  0x2c   : > { %343 = vst [vmem:[%s2976_s16 + $0x170] sm:$0xff] %v342_v46  ;;  %345 = vst [vmem:[%s2976_s16 + $0x178] sm:$0xff] %v344_v47  ;;  %v346_v48 = vld [vmem:[%s2971_s15 + $0x300] sm:$0xff]  ;;  %v348_v49 = vld [vmem:[%s2971_s15 + $0x308] sm:$0xff] }
  0x2d   : > { %v350_v50 = vld [vmem:[%s2971_s15 + $0x320] sm:$0xff]  ;;  %347 = vst [vmem:[%s2976_s16 + $0x180] sm:$0xff] %v346_v48  ;;  %349 = vst [vmem:[%s2976_s16 + $0x188] sm:$0xff] %v348_v49  ;;  %v352_v51 = vld [vmem:[%s2971_s15 + $0x328] sm:$0xff] }
  0x2e   : > { %351 = vst [vmem:[%s2976_s16 + $0x190] sm:$0xff] %v350_v50  ;;  %v354_v52 = vld [vmem:[%s2971_s15 + $0x340] sm:$0xff]  ;;  %v356_v53 = vld [vmem:[%s2971_s15 + $0x348] sm:$0xff]  ;;  %353 = vst [vmem:[%s2976_s16 + $0x198] sm:$0xff] %v352_v51 }
  0x2f   : > { %355 = vst [vmem:[%s2976_s16 + $0x1a0] sm:$0xff] %v354_v52  ;;  %357 = vst [vmem:[%s2976_s16 + $0x1a8] sm:$0xff] %v356_v53  ;;  %v358_v54 = vld [vmem:[%s2971_s15 + $0x360] sm:$0xff]  ;;  %v360_v55 = vld [vmem:[%s2971_s15 + $0x368] sm:$0xff] }
  0x30   : > { %v362_v56 = vld [vmem:[%s2971_s15 + $0x380] sm:$0xff]  ;;  %359 = vst [vmem:[%s2976_s16 + $0x1b0] sm:$0xff] %v358_v54  ;;  %361 = vst [vmem:[%s2976_s16 + $0x1b8] sm:$0xff] %v360_v55  ;;  %v364_v57 = vld [vmem:[%s2971_s15 + $0x388] sm:$0xff] }
  0x31   : > { %363 = vst [vmem:[%s2976_s16 + $0x1c0] sm:$0xff] %v362_v56  ;;  %v366_v58 = vld [vmem:[%s2971_s15 + $0x3a0] sm:$0xff]  ;;  %v368_v59 = vld [vmem:[%s2971_s15 + $0x3a8] sm:$0xff]  ;;  %365 = vst [vmem:[%s2976_s16 + $0x1c8] sm:$0xff] %v364_v57 }
  0x32   : > { %367 = vst [vmem:[%s2976_s16 + $0x1d0] sm:$0xff] %v366_v58  ;;  %369 = vst [vmem:[%s2976_s16 + $0x1d8] sm:$0xff] %v368_v59  ;;  %v370_v60 = vld [vmem:[%s2971_s15 + $0x3c0] sm:$0xff]  ;;  %v372_v61 = vld [vmem:[%s2971_s15 + $0x3c8] sm:$0xff] }
  0x33   : > { %v374_v62 = vld [vmem:[%s2971_s15 + $0x3e0] sm:$0xff]  ;;  %371 = vst [vmem:[%s2976_s16 + $0x1e0] sm:$0xff] %v370_v60  ;;  %373 = vst [vmem:[%s2976_s16 + $0x1e8] sm:$0xff] %v372_v61  ;;  %v376_v63 = vld [vmem:[%s2971_s15 + $0x3e8] sm:$0xff] }
  0x34   : > { %375 = vst [vmem:[%s2976_s16 + $0x1f0] sm:$0xff] %v374_v62  ;;  %377 = vst [vmem:[%s2976_s16 + $0x1f8] sm:$0xff] %v376_v63 }
  0x35 PF: > { %p2517_p7 = scmp.ge.s32.totalorder %s2888_s26, 1  ;;  %p382_p8 = scmp.lt.s32.totalorder %s2888_s26, 3 }
  0x37   : > { %p383_p9 = pnand %p2517_p7, %p382_p8 }
  0x38   : > { %s389_s17 = sand.u32 (!%p383_p9), 1, %s2880_s24   ;;  %v2808_v0 = vld [vmem:[%s3618_s1 + $0x4] ss:$8 sps:$4 sm:$0xff] (!%p383_p9)   ;;  %vm1712_vm0 = vcmask (!%p383_p9), 261120  }
  0x39   : > { %386 = sbr.rel (%p383_p9) target bundleno = 1004 (0x3ec), region = 67  ;;  %s2518_s18 = sshll.u32 (!%p383_p9), %s389_s17, 9  ;;  %1030 = vmatprep.mubr.bf16.mxu0 (!%p383_p9), %v2808_v0  ;;  %1223 = vmatprep.mubr.bf16.mxu1 (!%p383_p9), %v2808_v0 }
  0x3a   : > { %s3111_s21 = scalar_lea.vmem (!%p383_p9), [#allocation2], %s2518_s18  ;;  %s2519_s13 = sshll.u32 (!%p383_p9), %s389_s17, 7 }
  0x3b   : > { %v2710_v1 = vld [vmem:[%s3111_s21 + $0x4] ss:$16 sps:$4 sm:$0xff] (!%p383_p9)   ;;  %v2712_v2 = vld [vmem:[%s3111_s21 + $0xc] ss:$16 sps:$4 sm:$0xff] (!%p383_p9)   ;;  %v2714_v3 = vld [vmem:[%s3111_s21] ss:$16 sps:$4 sm:$0xff] (!%p383_p9)  }
  0x3c   : > { %998 = vmatprep.subr.bf16.mxu0 (!%p383_p9), %v2710_v1  ;;  %v2715_v4 = vld [vmem:[%s3111_s21 + $0x8] ss:$16 sps:$4 sm:$0xff] (!%p383_p9)   ;;  %1191 = vmatprep.subr.bf16.mxu1 (!%p383_p9), %v2712_v2  ;;  %v2716_v5 = vld [vmem:[%s3111_s21 + $0x24] ss:$16 sps:$4 sm:$0xff] (!%p383_p9)   ;;  %v2718_v6 = vld [vmem:[%s3111_s21 + $0x2c] ss:$16 sps:$4 sm:$0xff] (!%p383_p9)  }
  0x3d   : > { %999 = vmatpush1.bf16.msra.mxu0 (!%p383_p9), %v2714_v3  ;;  %1192 = vmatpush1.bf16.msra.mxu1 (!%p383_p9), %v2715_v4  ;;  %v2720_v7 = vld [vmem:[%s3111_s21 + $0x20] ss:$16 sps:$4 sm:$0xff] (!%p383_p9)   ;;  %v2721_v8 = vld [vmem:[%s3111_s21 + $0x28] ss:$16 sps:$4 sm:$0xff] (!%p383_p9)   ;;  %v2722_v9 = vld [vmem:[%s3111_s21 + $0x44] ss:$16 sps:$4 sm:$0xff] (!%p383_p9)  }
  0x3e   : > { %1000 = vmatprep.subr.bf16.mxu0 (!%p383_p9), %v2716_v5  ;;  %1193 = vmatprep.subr.bf16.mxu1 (!%p383_p9), %v2718_v6  ;;  %v2724_v10 = vld [vmem:[%s3111_s21 + $0x4c] ss:$16 sps:$4 sm:$0xff] (!%p383_p9)   ;;  %v2726_v11 = vld [vmem:[%s3111_s21 + $0x40] ss:$16 sps:$4 sm:$0xff] (!%p383_p9)   ;;  %v2727_v12 = vld [vmem:[%s3111_s21 + $0x48] ss:$16 sps:$4 sm:$0xff] (!%p383_p9)  }
  0x3f   : > { %v2728_v13 = vld [vmem:[%s3111_s21 + $0x64] ss:$16 sps:$4 sm:$0xff] (!%p383_p9)   ;;  %v2730_v14 = vld [vmem:[%s3111_s21 + $0x6c] ss:$16 sps:$4 sm:$0xff] (!%p383_p9)   ;;  %v2732_v15 = vld [vmem:[%s3111_s21 + $0x60] ss:$16 sps:$4 sm:$0xff] (!%p383_p9)  }
  0x40   : > { %v2733_v16 = vld [vmem:[%s3111_s21 + $0x68] ss:$16 sps:$4 sm:$0xff]   ;;  %v2734_v17 = vld [vmem:[%s3111_s21 + $0x84] ss:$16 sps:$4 sm:$0xff]   ;;  %v2736_v18 = vld [vmem:[%s3111_s21 + $0x8c] ss:$16 sps:$4 sm:$0xff]  }
  0x41   : > { %1001 = vmatpush1.bf16.msra.mxu0 %v2720_v7  ;;  %1194 = vmatpush1.bf16.msra.mxu1 %v2721_v8  ;;  %v2738_v19 = vld [vmem:[%s3111_s21 + $0x80] ss:$16 sps:$4 sm:$0xff]   ;;  %v2739_v20 = vld [vmem:[%s3111_s21 + $0x88] ss:$16 sps:$4 sm:$0xff]   ;;  %v2740_v21 = vld [vmem:[%s3111_s21 + $0xa4] ss:$16 sps:$4 sm:$0xff]  }
  0x42   : > { %1002 = vmatprep.subr.bf16.mxu0 %v2722_v9  ;;  %1195 = vmatprep.subr.bf16.mxu1 %v2724_v10  ;;  %v2742_v22 = vld [vmem:[%s3111_s21 + $0xac] ss:$16 sps:$4 sm:$0xff]   ;;  %v2744_v23 = vld [vmem:[%s3111_s21 + $0xa0] ss:$16 sps:$4 sm:$0xff]   ;;  %v2745_v24 = vld [vmem:[%s3111_s21 + $0xa8] ss:$16 sps:$4 sm:$0xff]  }
  0x43   : > { %v2746_v25 = vld [vmem:[%s3111_s21 + $0xc4] ss:$16 sps:$4 sm:$0xff]   ;;  %v2748_v26 = vld [vmem:[%s3111_s21 + $0xcc] ss:$16 sps:$4 sm:$0xff]   ;;  %v2750_v27 = vld [vmem:[%s3111_s21 + $0xc0] ss:$16 sps:$4 sm:$0xff]  }
  0x44   : > { %v2751_v28 = vld [vmem:[%s3111_s21 + $0xc8] ss:$16 sps:$4 sm:$0xff]   ;;  %v2752_v29 = vld [vmem:[%s3111_s21 + $0xe4] ss:$16 sps:$4 sm:$0xff]   ;;  %v2754_v30 = vld [vmem:[%s3111_s21 + $0xec] ss:$16 sps:$4 sm:$0xff]  }
  0x45   : > { %1003 = vmatpush1.bf16.msra.mxu0 %v2726_v11  ;;  %1196 = vmatpush1.bf16.msra.mxu1 %v2727_v12  ;;  %v2756_v31 = vld [vmem:[%s3111_s21 + $0xe0] ss:$16 sps:$4 sm:$0xff]   ;;  %v2757_v32 = vld [vmem:[%s3111_s21 + $0xe8] ss:$16 sps:$4 sm:$0xff]   ;;  %v2758_v33 = vld [vmem:[%s3111_s21 + $0x104] ss:$16 sps:$4 sm:$0xff]  }
  0x46   : > { %1004 = vmatprep.subr.bf16.mxu0 %v2728_v13  ;;  %1197 = vmatprep.subr.bf16.mxu1 %v2730_v14  ;;  %v2760_v34 = vld [vmem:[%s3111_s21 + $0x10c] ss:$16 sps:$4 sm:$0xff]   ;;  %v2762_v35 = vld [vmem:[%s3111_s21 + $0x100] ss:$16 sps:$4 sm:$0xff]   ;;  %v2763_v36 = vld [vmem:[%s3111_s21 + $0x108] ss:$16 sps:$4 sm:$0xff]  }
  0x47   : > { %v2764_v37 = vld [vmem:[%s3111_s21 + $0x124] ss:$16 sps:$4 sm:$0xff]   ;;  %v2766_v38 = vld [vmem:[%s3111_s21 + $0x12c] ss:$16 sps:$4 sm:$0xff]   ;;  %v2768_v39 = vld [vmem:[%s3111_s21 + $0x120] ss:$16 sps:$4 sm:$0xff]  }
  0x48   : > { %v2769_v40 = vld [vmem:[%s3111_s21 + $0x128] ss:$16 sps:$4 sm:$0xff]   ;;  %v2770_v41 = vld [vmem:[%s3111_s21 + $0x144] ss:$16 sps:$4 sm:$0xff]   ;;  %v2772_v42 = vld [vmem:[%s3111_s21 + $0x14c] ss:$16 sps:$4 sm:$0xff]  }
  0x49   : > { %1005 = vmatpush1.bf16.msra.mxu0 %v2732_v15  ;;  %1198 = vmatpush1.bf16.msra.mxu1 %v2733_v16  ;;  %v2774_v43 = vld [vmem:[%s3111_s21 + $0x140] ss:$16 sps:$4 sm:$0xff]   ;;  %v2775_v44 = vld [vmem:[%s3111_s21 + $0x148] ss:$16 sps:$4 sm:$0xff]   ;;  %v2776_v45 = vld [vmem:[%s3111_s21 + $0x164] ss:$16 sps:$4 sm:$0xff]  }
  0x4a   : > { %1006 = vmatprep.subr.bf16.mxu0 %v2734_v17  ;;  %1199 = vmatprep.subr.bf16.mxu1 %v2736_v18  ;;  %v2778_v46 = vld [vmem:[%s3111_s21 + $0x16c] ss:$16 sps:$4 sm:$0xff]   ;;  %v2780_v47 = vld [vmem:[%s3111_s21 + $0x160] ss:$16 sps:$4 sm:$0xff]   ;;  %v2781_v48 = vld [vmem:[%s3111_s21 + $0x168] ss:$16 sps:$4 sm:$0xff]  }
  0x4b   : > { %v2782_v49 = vld [vmem:[%s3111_s21 + $0x184] ss:$16 sps:$4 sm:$0xff]   ;;  %v2784_v50 = vld [vmem:[%s3111_s21 + $0x18c] ss:$16 sps:$4 sm:$0xff]   ;;  %v2786_v51 = vld [vmem:[%s3111_s21 + $0x180] ss:$16 sps:$4 sm:$0xff]  }
  0x4c   : > { %v2787_v52 = vld [vmem:[%s3111_s21 + $0x188] ss:$16 sps:$4 sm:$0xff]   ;;  %v2788_v53 = vld [vmem:[%s3111_s21 + $0x1a4] ss:$16 sps:$4 sm:$0xff]   ;;  %v2790_v54 = vld [vmem:[%s3111_s21 + $0x1ac] ss:$16 sps:$4 sm:$0xff]  }
  0x4d   : > { %1007 = vmatpush1.bf16.msra.mxu0 %v2738_v19  ;;  %1200 = vmatpush1.bf16.msra.mxu1 %v2739_v20  ;;  %v2792_v55 = vld [vmem:[%s3111_s21 + $0x1a0] ss:$16 sps:$4 sm:$0xff]   ;;  %v2793_v56 = vld [vmem:[%s3111_s21 + $0x1a8] ss:$16 sps:$4 sm:$0xff]   ;;  %v2794_v57 = vld [vmem:[%s3111_s21 + $0x1c4] ss:$16 sps:$4 sm:$0xff]  }
  0x4e   : > { %1008 = vmatprep.subr.bf16.mxu0 %v2740_v21  ;;  %1201 = vmatprep.subr.bf16.mxu1 %v2742_v22  ;;  %v2796_v58 = vld [vmem:[%s3111_s21 + $0x1cc] ss:$16 sps:$4 sm:$0xff]   ;;  %v2798_v59 = vld [vmem:[%s3111_s21 + $0x1c0] ss:$16 sps:$4 sm:$0xff]   ;;  %v2799_v60 = vld [vmem:[%s3111_s21 + $0x1c8] ss:$16 sps:$4 sm:$0xff]  }
  0x4f   : > { %v2800_v61 = vld [vmem:[%s3111_s21 + $0x1e4] ss:$16 sps:$4 sm:$0xff]   ;;  %v2802_v62 = vld [vmem:[%s3111_s21 + $0x1ec] ss:$16 sps:$4 sm:$0xff]   ;;  %v2804_v63 = vld [vmem:[%s3111_s21 + $0x1e0] ss:$16 sps:$4 sm:$0xff]  }
  0x50   : > { %v2805_v0 = vld [vmem:[%s3111_s21 + $0x1e8] ss:$16 sps:$4 sm:$0xff]   ;;  %v1496_v1 = vld [vmem:[%s3619_s2] sm:$0xff]  ;;  %v2890_v2 = vmov 0   ;;  %v2809_v4 = vld [vmem:[%s3618_s1 + $0x14] ss:$8 sps:$4 sm:$0xff]  }
  0x51   : > { %1009 = vmatpush1.bf16.msra.mxu0 %v2744_v23  ;;  %1202 = vmatpush1.bf16.msra.mxu1 %v2745_v24  ;;  %v2806_v3 = vld [vmem:[%s3618_s1] ss:$8 sps:$4 sm:$0xff]   ;;  %v1498_v6 = vld [vmem:[%s3619_s2 + $0x10] sm:$0xff]  ;;  %v1499_v7 = vld [vmem:[%s3619_s2 + $0x18] sm:$0xff]  ;;  %s3566_s14 = scalar_lea.vmem [#allocation3], %s2519_s13  ;;  %s2682_s24 = sshll.u32 (%p2961_p5), %s2510_s27, 4 }
  0x52   : > { %1010 = vmatprep.subr.bf16.mxu0 %v2746_v25  ;;  %1203 = vmatprep.subr.bf16.mxu1 %v2748_v26  ;;  %v1497_v5 = vld [vmem:[%s3619_s2 + $0x8] sm:$0xff]  ;;  %v1576_v8 = vld [vmem:[%s3621_s4] sm:$0xff]  ;;  %v2811_v9 = vld [vmem:[%s3618_s1 + $0x10] ss:$8 sps:$4 sm:$0xff]   ;;  %s2406_s9 = scalar_lea.vmem (%p2961_p5), %s3624_s7, %s2682_s24 }
  0x53   : > { %2708 = vset.pattern.permute.xlu0 %v2890_v2  ;;  %2709 = vset.pattern.permute.xlu1 %v2890_v2  ;;  %v2812_v10 = vld [vmem:[%s3618_s1 + $0x24] ss:$8 sps:$4 sm:$0xff]   ;;  %v1578_v11 = vld [vmem:[%s3621_s4 + $0x10] sm:$0xff]  ;;  %v2814_v13 = vld [vmem:[%s3618_s1 + $0x20] ss:$8 sps:$4 sm:$0xff]  }
  0x54   : > { %1502 = vperm.xlu0 %2708, %v1496_v1   ;;  %1512 = vperm.xlu1 %2709, %v1498_v6   ;;  %v1580_v12 = vld [vmem:[%s3621_s4 + $0x20] sm:$0xff]  ;;  %v2815_v14 = vld [vmem:[%s3618_s1 + $0x34] ss:$8 sps:$4 sm:$0xff]   ;;  %v2817_v17 = vld [vmem:[%s3618_s1 + $0x30] ss:$8 sps:$4 sm:$0xff]  }
  0x55   : > { %1011 = vmatpush1.bf16.msra.mxu0 %v2750_v27  ;;  %1204 = vmatpush1.bf16.msra.mxu1 %v2751_v28  ;;  %v1582_v15 = vld [vmem:[%s3621_s4 + $0x30] sm:$0xff]  ;;  %v1584_v16 = vld [vmem:[%s3621_s4 + $0x40] sm:$0xff]  ;;  %v1577_v24 = vld [vmem:[%s3621_s4 + $0x8] sm:$0xff] }
  0x56   : > { %1012 = vmatprep.subr.bf16.mxu0 %v2752_v29  ;;  %1205 = vmatprep.subr.bf16.mxu1 %v2754_v30  ;;  %v2818_v18 = vld [vmem:[%s3618_s1 + $0x44] ss:$8 sps:$4 sm:$0xff]   ;;  %v1586_v19 = vld [vmem:[%s3621_s4 + $0x50] sm:$0xff]  ;;  %v2820_v21 = vld [vmem:[%s3618_s1 + $0x40] ss:$8 sps:$4 sm:$0xff]  }
  0x57   : > { %v1588_v20 = vld [vmem:[%s3621_s4 + $0x60] sm:$0xff]  ;;  %v2821_v22 = vld [vmem:[%s3618_s1 + $0x54] ss:$8 sps:$4 sm:$0xff]   ;;  %v2823_v26 = vld [vmem:[%s3618_s1 + $0x50] ss:$8 sps:$4 sm:$0xff]  }
  0x58   : > { %1507 = vperm.xlu0 %2708, %v1497_v5   ;;  %1517 = vperm.xlu1 %2709, %v1499_v7   ;;  %v1590_v23 = vld [vmem:[%s3621_s4 + $0x70] sm:$0xff]  ;;  %v2067_v25 = vld [vmem:[%s3623_s6] sm:$0xff]  ;;  %v1579_v27 = vld [vmem:[%s3621_s4 + $0x18] sm:$0xff] }
  0x59   : > { %1013 = vmatpush1.bf16.msra.mxu0 %v2756_v31  ;;  %1206 = vmatpush1.bf16.msra.mxu1 %v2757_v32  ;;  %v2824_v28 = vld [vmem:[%s3618_s1 + $0x64] ss:$8 sps:$4 sm:$0xff]   ;;  %v2069_v29 = vld [vmem:[%s3623_s6 + $0x10] sm:$0xff]  ;;  %v2826_v32 = vld [vmem:[%s3618_s1 + $0x60] ss:$8 sps:$4 sm:$0xff]  }
  0x5a   : > { %1014 = vmatprep.subr.bf16.mxu0 %v2758_v33  ;;  %1207 = vmatprep.subr.bf16.mxu1 %v2760_v34  ;;  %v1581_v30 = vld [vmem:[%s3621_s4 + $0x28] sm:$0xff]  ;;  %v2071_v31 = vld [vmem:[%s3623_s6 + $0x20] sm:$0xff]  ;;  %v1583_v33 = vld [vmem:[%s3621_s4 + $0x38] sm:$0xff] }
  0x5b   : > { %v2827_v34 = vld [vmem:[%s3618_s1 + $0x74] ss:$8 sps:$4 sm:$0xff]  }
  0x5c   : > { %1594 = vperm.xlu0 %2708, %v1576_v8   ;;  %1599 = vperm.xlu1 %2709, %v1577_v24  }
  0x5d   : > { %1015 = vmatpush1.bf16.msra.mxu0 %v2762_v35  ;;  %1208 = vmatpush1.bf16.msra.mxu1 %v2763_v36  ;;  %v2073_v35 = vld [vmem:[%s3623_s6 + $0x30] sm:$0xff]  ;;  %v1585_v36 = vld [vmem:[%s3621_s4 + $0x48] sm:$0xff] }
  0x5e   : > { %1016 = vmatprep.subr.bf16.mxu0 %v2764_v37  ;;  %1209 = vmatprep.subr.bf16.mxu1 %v2766_v38  ;;  %v2829_v37 = vld [vmem:[%s3618_s1 + $0x70] ss:$8 sps:$4 sm:$0xff]  }
  0x5f   : > { %v1587_v38 = vld [vmem:[%s3621_s4 + $0x58] sm:$0xff] }
  0x60   : > { %1604 = vperm.xlu0 %2708, %v1578_v11   ;;  %1609 = vperm.xlu1 %2709, %v1579_v27  }
  0x61   : > { %1017 = vmatpush1.bf16.msra.mxu0 %v2768_v39  ;;  %1210 = vmatpush1.bf16.msra.mxu1 %v2769_v40  ;;  %v2830_v39 = vld [vmem:[%s3618_s1 + $0x84] ss:$8 sps:$4 sm:$0xff]  }
  0x62   : > { %1018 = vmatprep.subr.bf16.mxu0 %v2770_v41  ;;  %1211 = vmatprep.subr.bf16.mxu1 %v2772_v42  ;;  %v1589_v40 = vld [vmem:[%s3621_s4 + $0x68] sm:$0xff]  ;;  %v1591_v42 = vld [vmem:[%s3621_s4 + $0x78] sm:$0xff] }
  0x63   : > { %v2832_v41 = vld [vmem:[%s3618_s1 + $0x80] ss:$8 sps:$4 sm:$0xff]  }
  0x64   : > { %1614 = vperm.xlu0 %2708, %v1580_v12   ;;  %1619 = vperm.xlu1 %2709, %v1581_v30  }
  0x65   : > { %1019 = vmatpush1.bf16.msra.mxu0 %v2774_v43  ;;  %1212 = vmatpush1.bf16.msra.mxu1 %v2775_v44  ;;  %v2833_v43 = vld [vmem:[%s3618_s1 + $0x94] ss:$8 sps:$4 sm:$0xff]   ;;  %v2068_v44 = vld [vmem:[%s3623_s6 + $0x8] sm:$0xff] }
  0x66   : > { %1020 = vmatprep.subr.bf16.mxu0 %v2776_v45  ;;  %1213 = vmatprep.subr.bf16.mxu1 %v2778_v46  ;;  %v2835_v45 = vld [vmem:[%s3618_s1 + $0x90] ss:$8 sps:$4 sm:$0xff]  }
  0x67   : > { %v2070_v46 = vld [vmem:[%s3623_s6 + $0x18] sm:$0xff] }
  0x68   : > { %1624 = vperm.xlu0 %2708, %v1582_v15   ;;  %1629 = vperm.xlu1 %2709, %v1583_v33  }
  0x69   : > { %1021 = vmatpush1.bf16.msra.mxu0 %v2780_v47  ;;  %1214 = vmatpush1.bf16.msra.mxu1 %v2781_v48  ;;  %v2836_v47 = vld [vmem:[%s3618_s1 + $0xa4] ss:$8 sps:$4 sm:$0xff]  }
  0x6a   : > { %1022 = vmatprep.subr.bf16.mxu0 %v2782_v49  ;;  %1215 = vmatprep.subr.bf16.mxu1 %v2784_v50  ;;  %v2072_v48 = vld [vmem:[%s3623_s6 + $0x28] sm:$0xff]  ;;  %v2074_v50 = vld [vmem:[%s3623_s6 + $0x38] sm:$0xff] }
  0x6b   : > { %v2838_v49 = vld [vmem:[%s3618_s1 + $0xa0] ss:$8 sps:$4 sm:$0xff]  }
  0x6c   : > { %1634 = vperm.xlu0 %2708, %v1584_v16   ;;  %1639 = vperm.xlu1 %2709, %v1585_v36  }
  0x6d   : > { %1023 = vmatpush1.bf16.msra.mxu0 %v2786_v51  ;;  %1216 = vmatpush1.bf16.msra.mxu1 %v2787_v52  ;;  %v2839_v51 = vld [vmem:[%s3618_s1 + $0xb4] ss:$8 sps:$4 sm:$0xff]   ;;  %v2841_v52 = vld [vmem:[%s3618_s1 + $0xb0] ss:$8 sps:$4 sm:$0xff]  }
  0x6e   : > { %1024 = vmatprep.subr.bf16.mxu0 %v2788_v53  ;;  %1217 = vmatprep.subr.bf16.mxu1 %v2790_v54  ;;  %v2842_v53 = vld [vmem:[%s3618_s1 + $0xc4] ss:$8 sps:$4 sm:$0xff]   ;;  %v2844_v54 = vld [vmem:[%s3618_s1 + $0xc0] ss:$8 sps:$4 sm:$0xff]  }
  0x70   : > { %1644 = vperm.xlu0 %2708, %v1586_v19   ;;  %1649 = vperm.xlu1 %2709, %v1587_v38  }
  0x71   : > { %1025 = vmatpush1.bf16.msra.mxu0 %v2792_v55  ;;  %1218 = vmatpush1.bf16.msra.mxu1 %v2793_v56  ;;  %v2845_v55 = vld [vmem:[%s3618_s1 + $0xd4] ss:$8 sps:$4 sm:$0xff]   ;;  %v2847_v56 = vld [vmem:[%s3618_s1 + $0xd0] ss:$8 sps:$4 sm:$0xff]  }
  0x72   : > { %1026 = vmatprep.subr.bf16.mxu0 %v2794_v57  ;;  %1219 = vmatprep.subr.bf16.mxu1 %v2796_v58  ;;  %v2848_v57 = vld [vmem:[%s3618_s1 + $0xe4] ss:$8 sps:$4 sm:$0xff]   ;;  %v2850_v58 = vld [vmem:[%s3618_s1 + $0xe0] ss:$8 sps:$4 sm:$0xff]  }
  0x74   : > { %1654 = vperm.xlu0 %2708, %v1588_v20   ;;  %1659 = vperm.xlu1 %2709, %v1589_v40  }
  0x75   : > { %1027 = vmatpush1.bf16.msra.mxu0 %v2798_v59  ;;  %1220 = vmatpush1.bf16.msra.mxu1 %v2799_v60  ;;  %v2851_v59 = vld [vmem:[%s3618_s1 + $0xf4] ss:$8 sps:$4 sm:$0xff]   ;;  %v2853_v60 = vld [vmem:[%s3618_s1 + $0xf0] ss:$8 sps:$4 sm:$0xff]  }
  0x76   : > { %1028 = vmatprep.subr.bf16.mxu0 %v2800_v61  ;;  %1221 = vmatprep.subr.bf16.mxu1 %v2802_v62 }
  0x78   : > { %1664 = vperm.xlu0 %2708, %v1590_v23   ;;  %1669 = vperm.xlu1 %2709, %v1591_v42  }
  0x79   : > { %1029 = vmatpush1.bf16.msra.mxu0 %v2804_v63  ;;  %1222 = vmatpush1.bf16.msra.mxu1 %v2805_v0 }
  0x7c   : > { %1031 = vmatmul.mubr.bf16.vlgmr.msra.gmra.mrb[0].mxu0 %v2806_v3  ;;  %1224 = vmatmul.mubr.bf16.vlgmr.msra.gmra.mrb[0].mxu1 %v2806_v3 }
  0x7d   : > { %1040 = vmatprep.mubr.bf16.mxu0 %v2809_v4  ;;  %1233 = vmatprep.mubr.bf16.mxu1 %v2809_v4 }
  0x7e   : > { %2077 = vperm.xlu0 %2708, %v2067_v25   ;;  %2082 = vperm.xlu1 %2709, %v2068_v44  }
  0x82   : > { %2087 = vperm.xlu0 %2708, %v2069_v29   ;;  %2092 = vperm.xlu1 %2709, %v2070_v46  }
  0x84   : > { %1041 = vmatmul.mubr.bf16.gmra.mrb[4].mxu0 %v2811_v9  ;;  %1234 = vmatmul.mubr.bf16.gmra.mrb[4].mxu1 %v2811_v9 }
  0x85   : > { %1050 = vmatprep.mubr.bf16.mxu0 %v2812_v10  ;;  %1243 = vmatprep.mubr.bf16.mxu1 %v2812_v10 }
  0x86   : > { %2097 = vperm.xlu0 %2708, %v2071_v31   ;;  %2102 = vperm.xlu1 %2709, %v2072_v48  }
  0x8a   : > { %2107 = vperm.xlu0 %2708, %v2073_v35   ;;  %2112 = vperm.xlu1 %2709, %v2074_v50  }
  0x8c   : > { %1051 = vmatmul.mubr.bf16.gmra.mrb[8].mxu0 %v2814_v13  ;;  %1244 = vmatmul.mubr.bf16.gmra.mrb[8].mxu1 %v2814_v13 }
  0x8d   : > { %1060 = vmatprep.mubr.bf16.mxu0 %v2815_v14  ;;  %1253 = vmatprep.mubr.bf16.mxu1 %v2815_v14 }
  0x94   : > { %1061 = vmatmul.mubr.bf16.gmra.mrb[12].mxu0 %v2817_v17  ;;  %1254 = vmatmul.mubr.bf16.gmra.mrb[12].mxu1 %v2817_v17 }
  0x95   : > { %1070 = vmatprep.mubr.bf16.mxu0 %v2818_v18  ;;  %1263 = vmatprep.mubr.bf16.mxu1 %v2818_v18 }
  0x9c   : > { %1071 = vmatmul.mubr.bf16.gmra.mrb[16].mxu0 %v2820_v21  ;;  %1264 = vmatmul.mubr.bf16.gmra.mrb[16].mxu1 %v2820_v21 }
  0x9d   : > { %1080 = vmatprep.mubr.bf16.mxu0 %v2821_v22  ;;  %1273 = vmatprep.mubr.bf16.mxu1 %v2821_v22 }
  0xa4   : > { %1081 = vmatmul.mubr.bf16.gmra.mrb[20].mxu0 %v2823_v26  ;;  %1274 = vmatmul.mubr.bf16.gmra.mrb[20].mxu1 %v2823_v26 }
  0xa5   : > { %1090 = vmatprep.mubr.bf16.mxu0 %v2824_v28  ;;  %1283 = vmatprep.mubr.bf16.mxu1 %v2824_v28 }
  0xac   : > { %1091 = vmatmul.mubr.bf16.gmra.mrb[24].mxu0 %v2826_v32  ;;  %1284 = vmatmul.mubr.bf16.gmra.mrb[24].mxu1 %v2826_v32 }
  0xad   : > { %1100 = vmatprep.mubr.bf16.mxu0 %v2827_v34  ;;  %1293 = vmatprep.mubr.bf16.mxu1 %v2827_v34 }
  0xb4   : > { %1101 = vmatmul.mubr.bf16.gmra.mrb[28].mxu0 %v2829_v37  ;;  %1294 = vmatmul.mubr.bf16.gmra.mrb[28].mxu1 %v2829_v37 }
  0xb5   : > { %1110 = vmatprep.mubr.bf16.mxu0 %v2830_v39  ;;  %1303 = vmatprep.mubr.bf16.mxu1 %v2830_v39 }
  0xbc   : > { %1111 = vmatmul.mubr.bf16.gmra.mrb[32].mxu0 %v2832_v41  ;;  %1304 = vmatmul.mubr.bf16.gmra.mrb[32].mxu1 %v2832_v41 }
  0xbd   : > { %1120 = vmatprep.mubr.bf16.mxu0 %v2833_v43  ;;  %1313 = vmatprep.mubr.bf16.mxu1 %v2833_v43 }
  0xc4   : > { %1121 = vmatmul.mubr.bf16.gmra.mrb[36].mxu0 %v2835_v45  ;;  %1314 = vmatmul.mubr.bf16.gmra.mrb[36].mxu1 %v2835_v45 }
  0xc5   : > { %1130 = vmatprep.mubr.bf16.mxu0 %v2836_v47  ;;  %1323 = vmatprep.mubr.bf16.mxu1 %v2836_v47 }
  0xcc   : > { %1131 = vmatmul.mubr.bf16.gmra.mrb[40].mxu0 %v2838_v49  ;;  %1324 = vmatmul.mubr.bf16.gmra.mrb[40].mxu1 %v2838_v49 }
  0xcd   : > { %1140 = vmatprep.mubr.bf16.mxu0 %v2839_v51  ;;  %1333 = vmatprep.mubr.bf16.mxu1 %v2839_v51 }
  0xd4   : > { %1141 = vmatmul.mubr.bf16.gmra.mrb[44].mxu0 %v2841_v52  ;;  %1334 = vmatmul.mubr.bf16.gmra.mrb[44].mxu1 %v2841_v52 }
  0xd5   : > { %1150 = vmatprep.mubr.bf16.mxu0 %v2842_v53  ;;  %1343 = vmatprep.mubr.bf16.mxu1 %v2842_v53 }
  0xdc   : > { %1151 = vmatmul.mubr.bf16.gmra.mrb[48].mxu0 %v2844_v54  ;;  %1344 = vmatmul.mubr.bf16.gmra.mrb[48].mxu1 %v2844_v54 }
  0xdd   : > { %1160 = vmatprep.mubr.bf16.mxu0 %v2845_v55  ;;  %1353 = vmatprep.mubr.bf16.mxu1 %v2845_v55 }
  0xe4   : > { %1161 = vmatmul.mubr.bf16.gmra.mrb[52].mxu0 %v2847_v56  ;;  %1354 = vmatmul.mubr.bf16.gmra.mrb[52].mxu1 %v2847_v56 }
  0xe5   : > { %1170 = vmatprep.mubr.bf16.mxu0 %v2848_v57  ;;  %1363 = vmatprep.mubr.bf16.mxu1 %v2848_v57 }
  0xec   : > { %1171 = vmatmul.mubr.bf16.gmra.mrb[56].mxu0 %v2850_v58  ;;  %1364 = vmatmul.mubr.bf16.gmra.mrb[56].mxu1 %v2850_v58 }
  0xed   : > { %1180 = vmatprep.mubr.bf16.mxu0 %v2851_v59  ;;  %1373 = vmatprep.mubr.bf16.mxu1 %v2851_v59 }
  0xf4   : > { %1181 = vmatmul.mubr.bf16.gmra.mrb[60].mxu0 %v2853_v60  ;;  %1374 = vmatmul.mubr.bf16.gmra.mrb[60].mxu1 %v2853_v60 }
  0xf5   : > { %1769 = vmatprep.mubr.bf16.mxu0 %v2890_v2  ;;  %1882 = vmatprep.mubr.bf16.mxu1 %v2890_v2 }
 0x14f   : > { %v1032_v61 = vpop.f32.mrb[0].mxu0  ;;  %v1225_v62 = vpop.f32.mrb[0].mxu1 }
 0x150   : > { %v1034_v63 = vpop.f32.mrb[1].mxu0  ;;  %v1227_v0 = vpop.f32.mrb[1].mxu1 }
 0x151   : > { %v1036_v1 = vpop.f32.mrb[2].mxu0  ;;  %v1229_v3 = vpop.f32.mrb[2].mxu1 }
 0x152   : > { %v1038_v4 = vpop.f32.mrb[3].mxu0  ;;  %v1231_v5 = vpop.f32.mrb[3].mxu1 }
 0x157   : > { %v1042_v6 = vpop.f32.mrb[4].mxu0  ;;  %v1235_v7 = vpop.f32.mrb[4].mxu1 }
 0x158   : > { %v1044_v8 = vpop.f32.mrb[5].mxu0  ;;  %v1237_v9 = vpop.f32.mrb[5].mxu1 }
 0x159   : > { %v3358_v10 = vpop.f32.mrb[6].mxu0  ;;  %v3360_v11 = vpop.f32.mrb[6].mxu1 }
 0x15a   : > { %v3362_v12 = vpop.f32.mrb[7].mxu0  ;;  %v3364_v13 = vpop.f32.mrb[7].mxu1 }
 0x15f   : > { %v1052_v14 = vpop.f32.mrb[8].mxu0  ;;  %v1245_v15 = vpop.f32.mrb[8].mxu1 }
 0x160   : > { %v1384_v16 = vmax.f32 %v1032_v61, %v1052_v14  ;;  %v1386_v17 = vmax.f32 %v1225_v62, %v1245_v15  ;;  %v1054_v18 = vpop.f32.mrb[9].mxu0  ;;  %v1247_v19 = vpop.f32.mrb[9].mxu1 }
 0x161   : > { %v1385_v20 = vmax.f32 %v1034_v63, %v1054_v18  ;;  %v1387_v21 = vmax.f32 %v1227_v0, %v1247_v19  ;;  %v1056_v22 = vpop.f32.mrb[10].mxu0  ;;  %v1249_v23 = vpop.f32.mrb[10].mxu1 }
 0x162   : > { %v1388_v24 = vmax.f32 %v1036_v1, %v1056_v22  ;;  %v1390_v25 = vmax.f32 %v1229_v3, %v1249_v23  ;;  %v1058_v26 = vpop.f32.mrb[11].mxu0  ;;  %v1251_v27 = vpop.f32.mrb[11].mxu1 }
 0x163   : > { %v1389_v28 = vmax.f32 %v1038_v4, %v1058_v26  ;;  %v1391_v29 = vmax.f32 %v1231_v5, %v1251_v27 }
 0x167   : > { %v1062_v30 = vpop.f32.mrb[12].mxu0  ;;  %v1255_v31 = vpop.f32.mrb[12].mxu1 }
 0x168   : > { %v1392_v32 = vmax.f32 %v1042_v6, %v1062_v30  ;;  %v1394_v33 = vmax.f32 %v1235_v7, %v1255_v31  ;;  %v1064_v34 = vpop.f32.mrb[13].mxu0  ;;  %v1257_v35 = vpop.f32.mrb[13].mxu1 }
 0x169   : > { %v1393_v36 = vmax.f32 %v1044_v8, %v1064_v34  ;;  %v1395_v37 = vmax.f32 %v1237_v9, %v1257_v35  ;;  %v1066_v38 = vpop.f32.mrb[14].mxu0  ;;  %v1259_v39 = vpop.f32.mrb[14].mxu1 }
 0x16a   : > { %v1396_v40 = vmax.f32 %v3358_v10, %v1066_v38  ;;  %v1398_v41 = vmax.f32 %v3360_v11, %v1259_v39  ;;  %v1068_v42 = vpop.f32.mrb[15].mxu0  ;;  %v1261_v43 = vpop.f32.mrb[15].mxu1 }
 0x16b   : > { %v1397_v44 = vmax.f32 %v3362_v12, %v1068_v42  ;;  %v1399_v45 = vmax.f32 %v3364_v13, %v1261_v43 }
 0x16f   : > { %v1072_v46 = vpop.f32.mrb[16].mxu0  ;;  %v1265_v47 = vpop.f32.mrb[16].mxu1 }
 0x170   : > { %v3370_v48 = vmax.f32 %v1384_v16, %v1072_v46  ;;  %v3372_v49 = vmax.f32 %v1386_v17, %v1265_v47  ;;  %v1074_v50 = vpop.f32.mrb[17].mxu0  ;;  %v1267_v51 = vpop.f32.mrb[17].mxu1 }
 0x171   : > { %v3374_v52 = vmax.f32 %v1385_v20, %v1074_v50  ;;  %v3376_v53 = vmax.f32 %v1387_v21, %v1267_v51  ;;  %v1076_v54 = vpop.f32.mrb[18].mxu0  ;;  %v1269_v55 = vpop.f32.mrb[18].mxu1 }
 0x172   : > { %v3378_v56 = vmax.f32 %v1388_v24, %v1076_v54  ;;  %v3380_v57 = vmax.f32 %v1390_v25, %v1269_v55  ;;  %v1078_v58 = vpop.f32.mrb[19].mxu0  ;;  %v1271_v59 = vpop.f32.mrb[19].mxu1 }
 0x173   : > { %v3382_v60 = vmax.f32 %v1389_v28, %v1078_v58  ;;  %v3384_v61 = vmax.f32 %v1391_v29, %v1271_v59 }
 0x177   : > { %v1082_v62 = vpop.f32.mrb[20].mxu0  ;;  %v1275_v63 = vpop.f32.mrb[20].mxu1 }
 0x178   : > { %v3386_v0 = vmax.f32 %v1392_v32, %v1082_v62  ;;  %v3388_v1 = vmax.f32 %v1394_v33, %v1275_v63  ;;  %v1084_v3 = vpop.f32.mrb[21].mxu0  ;;  %v1277_v4 = vpop.f32.mrb[21].mxu1 }
 0x179   : > { %v3390_v5 = vmax.f32 %v1393_v36, %v1084_v3  ;;  %v3392_v6 = vmax.f32 %v1395_v37, %v1277_v4  ;;  %v1086_v7 = vpop.f32.mrb[22].mxu0  ;;  %v1279_v8 = vpop.f32.mrb[22].mxu1 }
 0x17a   : > { %v3394_v9 = vmax.f32 %v1396_v40, %v1086_v7  ;;  %v3396_v10 = vmax.f32 %v1398_v41, %v1279_v8  ;;  %v1088_v11 = vpop.f32.mrb[23].mxu0  ;;  %v1281_v12 = vpop.f32.mrb[23].mxu1 }
 0x17b   : > { %v3398_v13 = vmax.f32 %v1397_v44, %v1088_v11  ;;  %v3400_v14 = vmax.f32 %v1399_v45, %v1281_v12 }
 0x17f   : > { %v1092_v15 = vpop.f32.mrb[24].mxu0  ;;  %v1285_v16 = vpop.f32.mrb[24].mxu1 }
 0x180   : > { %v1416_v17 = vmax.f32 %v3370_v48, %v1092_v15  ;;  %v1418_v18 = vmax.f32 %v3372_v49, %v1285_v16  ;;  %v1094_v19 = vpop.f32.mrb[25].mxu0  ;;  %v1287_v20 = vpop.f32.mrb[25].mxu1 }
 0x181   : > { %v1417_v21 = vmax.f32 %v3374_v52, %v1094_v19  ;;  %v1419_v22 = vmax.f32 %v3376_v53, %v1287_v20  ;;  %v1096_v23 = vpop.f32.mrb[26].mxu0  ;;  %v1289_v24 = vpop.f32.mrb[26].mxu1 }
 0x182   : > { %v1420_v25 = vmax.f32 %v3378_v56, %v1096_v23  ;;  %v1422_v26 = vmax.f32 %v3380_v57, %v1289_v24  ;;  %v1098_v27 = vpop.f32.mrb[27].mxu0  ;;  %v1291_v28 = vpop.f32.mrb[27].mxu1 }
 0x183   : > { %v1421_v29 = vmax.f32 %v3382_v60, %v1098_v27  ;;  %v1423_v30 = vmax.f32 %v3384_v61, %v1291_v28 }
 0x187   : > { %v1102_v31 = vpop.f32.mrb[28].mxu0  ;;  %v1295_v32 = vpop.f32.mrb[28].mxu1 }
 0x188   : > { %v1424_v33 = vmax.f32 %v3386_v0, %v1102_v31  ;;  %v1426_v34 = vmax.f32 %v3388_v1, %v1295_v32  ;;  %v1104_v35 = vpop.f32.mrb[29].mxu0  ;;  %v1297_v36 = vpop.f32.mrb[29].mxu1 }
 0x189   : > { %v1425_v37 = vmax.f32 %v3390_v5, %v1104_v35  ;;  %v1427_v38 = vmax.f32 %v3392_v6, %v1297_v36  ;;  %v1106_v39 = vpop.f32.mrb[30].mxu0  ;;  %v1299_v40 = vpop.f32.mrb[30].mxu1 }
 0x18a   : > { %v1428_v41 = vmax.f32 %v3394_v9, %v1106_v39  ;;  %v1430_v42 = vmax.f32 %v3396_v10, %v1299_v40  ;;  %v1108_v43 = vpop.f32.mrb[31].mxu0  ;;  %v1301_v44 = vpop.f32.mrb[31].mxu1 }
 0x18b   : > { %v1429_v45 = vmax.f32 %v3398_v13, %v1108_v43  ;;  %v1431_v46 = vmax.f32 %v3400_v14, %v1301_v44 }
 0x18f   : > { %v1112_v47 = vpop.f32.mrb[32].mxu0  ;;  %v1305_v48 = vpop.f32.mrb[32].mxu1 }
 0x190   : > { %v3418_v49 = vmax.f32 %v1416_v17, %v1112_v47  ;;  %v3420_v50 = vmax.f32 %v1418_v18, %v1305_v48  ;;  %v1114_v51 = vpop.f32.mrb[33].mxu0  ;;  %v1307_v52 = vpop.f32.mrb[33].mxu1 }
 0x191   : > { %v3422_v53 = vmax.f32 %v1417_v21, %v1114_v51  ;;  %v3424_v54 = vmax.f32 %v1419_v22, %v1307_v52  ;;  %v1116_v55 = vpop.f32.mrb[34].mxu0  ;;  %v1309_v56 = vpop.f32.mrb[34].mxu1 }
 0x192   : > { %v3426_v57 = vmax.f32 %v1420_v25, %v1116_v55  ;;  %v3428_v58 = vmax.f32 %v1422_v26, %v1309_v56  ;;  %v1118_v59 = vpop.f32.mrb[35].mxu0  ;;  %v1311_v60 = vpop.f32.mrb[35].mxu1 }
 0x193   : > { %v3430_v61 = vmax.f32 %v1421_v29, %v1118_v59  ;;  %v3432_v62 = vmax.f32 %v1423_v30, %v1311_v60 }
 0x197   : > { %v1122_v63 = vpop.f32.mrb[36].mxu0  ;;  %v1315_v0 = vpop.f32.mrb[36].mxu1 }
 0x198   : > { %v3434_v1 = vmax.f32 %v1424_v33, %v1122_v63  ;;  %v3436_v3 = vmax.f32 %v1426_v34, %v1315_v0  ;;  %v1124_v4 = vpop.f32.mrb[37].mxu0  ;;  %v1317_v5 = vpop.f32.mrb[37].mxu1 }
 0x199   : > { %v3438_v6 = vmax.f32 %v1425_v37, %v1124_v4  ;;  %v3440_v7 = vmax.f32 %v1427_v38, %v1317_v5  ;;  %v1126_v8 = vpop.f32.mrb[38].mxu0  ;;  %v1319_v9 = vpop.f32.mrb[38].mxu1 }
 0x19a   : > { %v3442_v10 = vmax.f32 %v1428_v41, %v1126_v8  ;;  %v3444_v11 = vmax.f32 %v1430_v42, %v1319_v9  ;;  %v1128_v12 = vpop.f32.mrb[39].mxu0  ;;  %v1321_v13 = vpop.f32.mrb[39].mxu1 }
 0x19b   : > { %v3446_v14 = vmax.f32 %v1429_v45, %v1128_v12  ;;  %v3448_v15 = vmax.f32 %v1431_v46, %v1321_v13 }
 0x19f   : > { %v1132_v16 = vpop.f32.mrb[40].mxu0  ;;  %v1325_v17 = vpop.f32.mrb[40].mxu1 }
 0x1a0   : > { %v1448_v18 = vmax.f32 %v3418_v49, %v1132_v16  ;;  %v1450_v19 = vmax.f32 %v3420_v50, %v1325_v17  ;;  %v1134_v20 = vpop.f32.mrb[41].mxu0  ;;  %v1327_v21 = vpop.f32.mrb[41].mxu1 }
 0x1a1   : > { %v1449_v22 = vmax.f32 %v3422_v53, %v1134_v20  ;;  %v1451_v23 = vmax.f32 %v3424_v54, %v1327_v21  ;;  %v1136_v24 = vpop.f32.mrb[42].mxu0  ;;  %v1329_v25 = vpop.f32.mrb[42].mxu1 }
 0x1a2   : > { %v1452_v26 = vmax.f32 %v3426_v57, %v1136_v24  ;;  %v1454_v27 = vmax.f32 %v3428_v58, %v1329_v25  ;;  %v1138_v28 = vpop.f32.mrb[43].mxu0  ;;  %v1331_v29 = vpop.f32.mrb[43].mxu1 }
 0x1a3   : > { %v1453_v30 = vmax.f32 %v3430_v61, %v1138_v28  ;;  %v1455_v31 = vmax.f32 %v3432_v62, %v1331_v29  ;;  %v1503_v17 = vpop.permute.xlu0 %1502 }
 0x1a7   : > { %v1142_v32 = vpop.f32.mrb[44].mxu0  ;;  %v1335_v33 = vpop.f32.mrb[44].mxu1 }
 0x1a8   : > { %v1456_v34 = vmax.f32 %v3434_v1, %v1142_v32  ;;  %v1458_v35 = vmax.f32 %v3436_v3, %v1335_v33  ;;  %v1144_v36 = vpop.f32.mrb[45].mxu0  ;;  %v1337_v37 = vpop.f32.mrb[45].mxu1 }
 0x1a9   : > { %v1457_v38 = vmax.f32 %v3438_v6, %v1144_v36  ;;  %v1459_v39 = vmax.f32 %v3440_v7, %v1337_v37  ;;  %v1146_v40 = vpop.f32.mrb[46].mxu0  ;;  %v1339_v41 = vpop.f32.mrb[46].mxu1 }
 0x1aa   : > { %v1460_v42 = vmax.f32 %v3442_v10, %v1146_v40  ;;  %v1462_v43 = vmax.f32 %v3444_v11, %v1339_v41  ;;  %v1148_v44 = vpop.f32.mrb[47].mxu0  ;;  %v1341_v45 = vpop.f32.mrb[47].mxu1 }
 0x1ab   : > { %v1461_v46 = vmax.f32 %v3446_v14, %v1148_v44  ;;  %v1463_v47 = vmax.f32 %v3448_v15, %v1341_v45 }
 0x1af   : > { %v1152_v48 = vpop.f32.mrb[48].mxu0  ;;  %v1345_v49 = vpop.f32.mrb[48].mxu1 }
 0x1b0   : > { %v1464_v50 = vmax.f32 %v1448_v18, %v1152_v48  ;;  %v1466_v51 = vmax.f32 %v1450_v19, %v1345_v49  ;;  %v1154_v52 = vpop.f32.mrb[49].mxu0  ;;  %v1347_v53 = vpop.f32.mrb[49].mxu1 }
 0x1b1   : > { %v1465_v54 = vmax.f32 %v1449_v22, %v1154_v52  ;;  %v1467_v55 = vmax.f32 %v1451_v23, %v1347_v53  ;;  %v1156_v56 = vpop.f32.mrb[50].mxu0  ;;  %v1349_v57 = vpop.f32.mrb[50].mxu1 }
 0x1b2   : > { %v1468_v58 = vmax.f32 %v1452_v26, %v1156_v56  ;;  %v1470_v59 = vmax.f32 %v1454_v27, %v1349_v57  ;;  %v1158_v60 = vpop.f32.mrb[51].mxu0  ;;  %v1351_v61 = vpop.f32.mrb[51].mxu1 }
 0x1b3   : > { %v1469_v62 = vmax.f32 %v1453_v30, %v1158_v60  ;;  %v1471_v63 = vmax.f32 %v1455_v31, %v1351_v61 }
 0x1b7   : > { %v1162_v0 = vpop.f32.mrb[52].mxu0  ;;  %v1355_v1 = vpop.f32.mrb[52].mxu1 }
 0x1b8   : > { %v3466_v3 = vmax.f32 %v1456_v34, %v1162_v0  ;;  %v3468_v4 = vmax.f32 %v1458_v35, %v1355_v1  ;;  %v1164_v5 = vpop.f32.mrb[53].mxu0  ;;  %v1357_v6 = vpop.f32.mrb[53].mxu1 }
 0x1b9   : > { %v3470_v7 = vmax.f32 %v1457_v38, %v1164_v5  ;;  %v3472_v8 = vmax.f32 %v1459_v39, %v1357_v6  ;;  %v1166_v9 = vpop.f32.mrb[54].mxu0  ;;  %v1359_v10 = vpop.f32.mrb[54].mxu1 }
 0x1ba   : > { %v3474_v11 = vmax.f32 %v1460_v42, %v1166_v9  ;;  %v3476_v12 = vmax.f32 %v1462_v43, %v1359_v10  ;;  %v1168_v13 = vpop.f32.mrb[55].mxu0  ;;  %v1361_v14 = vpop.f32.mrb[55].mxu1 }
 0x1bb   : > { %v3478_v15 = vmax.f32 %v1461_v46, %v1168_v13  ;;  %v3480_v16 = vmax.f32 %v1463_v47, %v1361_v14  ;;  %v1508_v34 = vpop.permute.xlu0 %1507  ;;  %v1513_v43 = vpop.permute.xlu1 %1512 }
 0x1bf   : > { %v1172_v18 = vpop.f32.mrb[56].mxu0  ;;  %v1365_v19 = vpop.f32.mrb[56].mxu1 }
 0x1c0   : > { %v1480_v20 = vmax.f32 %v1464_v50, %v1172_v18  ;;  %v1482_v21 = vmax.f32 %v1466_v51, %v1365_v19  ;;  %v1174_v22 = vpop.f32.mrb[57].mxu0  ;;  %v1367_v23 = vpop.f32.mrb[57].mxu1 }
 0x1c1   : > { %v1481_v24 = vmax.f32 %v1465_v54, %v1174_v22  ;;  %v1483_v25 = vmax.f32 %v1467_v55, %v1367_v23  ;;  %v1176_v26 = vpop.f32.mrb[58].mxu0  ;;  %v1369_v27 = vpop.f32.mrb[58].mxu1 }
 0x1c2   : > { %v1520_v28 = vadd.f32 %v1503_v17, %v1480_v20  ;;  %v1522_v29 = vadd.f32 %v1503_v17, %v1482_v21  ;;  %v1484_v30 = vmax.f32 %v1468_v58, %v1176_v26  ;;  %v1486_v31 = vmax.f32 %v1470_v59, %v1369_v27  ;;  %v1178_v32 = vpop.f32.mrb[59].mxu0  ;;  %v1371_v33 = vpop.f32.mrb[59].mxu1 }
 0x1c3   : > { %v1521_v35 = vadd.f32 %v1503_v17, %v1481_v24  ;;  %v1523_v36 = vadd.f32 %v1503_v17, %v1483_v25  ;;  %v1485_v37 = vmax.f32 %v1469_v62, %v1178_v32  ;;  %v1487_v38 = vmax.f32 %v1471_v63, %v1371_v33  ;;  %v1518_v18 = vpop.permute.xlu1 %1517  ;;  %v2856_v32 = vld [vmem:[%s3620_s3 + $0x10] sm:$0xff]   ;;  %v2857_v33 = vld [vmem:[%s3620_s3 + $0x18] sm:$0xff]  }
 0x1c4   : > { %v1524_v39 = vadd.f32 %v1508_v34, %v1484_v30  ;;  %v1526_v40 = vadd.f32 %v1508_v34, %v1486_v31  ;;  %v1536_v44 = vmax.f32 %v1520_v28, 0.0  ;;  %v1538_v45 = vmax.f32 %v1522_v29, 0.0  ;;  %v2854_v30 = vld [vmem:[%s3620_s3] sm:$0xff]   ;;  %v2855_v31 = vld [vmem:[%s3620_s3 + $0x8] sm:$0xff]  }
 0x1c5   : > { %v1525_v41 = vadd.f32 %v1508_v34, %v1485_v37  ;;  %v1527_v42 = vadd.f32 %v1508_v34, %v1487_v38  ;;  %v1537_v48 = vmax.f32 %v1521_v35, 0.0  ;;  %v1539_v49 = vmax.f32 %v1523_v36, 0.0  ;;  %v2858_v34 = vld [vmem:[%s3620_s3 + $0x20] sm:$0xff]   ;;  %v2859_v35 = vld [vmem:[%s3620_s3 + $0x28] sm:$0xff]   ;;  %v2860_v36 = vld [vmem:[%s3620_s3 + $0x30] sm:$0xff]   ;;  %v1595_v38 = vpop.permute.xlu0 %1594 }
 0x1c6   : > { %v1540_v46 = vmax.f32 %v1524_v39, 0.0  ;;  %v1542_v47 = vmax.f32 %v1526_v40, 0.0  ;;  %v2861_v37 = vld [vmem:[%s3620_s3 + $0x38] sm:$0xff]  }
 0x1c7   : > { %v1541_v50 = vmax.f32 %v1525_v41, 0.0  ;;  %v1543_v51 = vmax.f32 %v1527_v42, 0.0  ;;  %v1182_v52 = vpop.f32.mrb[60].mxu0  ;;  %v1375_v53 = vpop.f32.mrb[60].mxu1 }
 0x1c8   : > { %v1568_v54 = vpack.c.bf16 %v1540_v46, %v1536_v44  ;;  %v1570_v55 = vpack.c.bf16 %v1542_v47, %v1538_v45  ;;  %v1488_v56 = vmax.f32 %v3466_v3, %v1182_v52  ;;  %v1490_v57 = vmax.f32 %v3468_v4, %v1375_v53  ;;  %v1184_v58 = vpop.f32.mrb[61].mxu0  ;;  %v1377_v59 = vpop.f32.mrb[61].mxu1 }
 0x1c9   : > { %v1489_v60 = vmax.f32 %v3470_v7, %v1184_v58  ;;  %v1491_v61 = vmax.f32 %v3472_v8, %v1377_v59  ;;  %v1186_v62 = vpop.f32.mrb[62].mxu0  ;;  %v1379_v63 = vpop.f32.mrb[62].mxu1  ;;  %v1569_v0 = vpack.c.bf16 %v1541_v50, %v1537_v48  ;;  %v1571_v1 = vpack.c.bf16 %v1543_v51, %v1539_v49 }
 0x1ca   : > { %v1528_v5 = vadd.f32 %v1513_v43, %v1488_v56  ;;  %v1530_v6 = vadd.f32 %v1513_v43, %v1490_v57  ;;  %v1492_v9 = vmax.f32 %v3474_v11, %v1186_v62  ;;  %v1494_v10 = vmax.f32 %v3476_v12, %v1379_v63  ;;  %v1188_v13 = vpop.f32.mrb[63].mxu0  ;;  %v1381_v3 = vpop.f32.mrb[63].mxu1 }
 0x1cb   : > { %v1529_v14 = vadd.f32 %v1513_v43, %v1489_v60  ;;  %v1531_v4 = vadd.f32 %v1513_v43, %v1491_v61  ;;  %v1493_v17 = vmax.f32 %v3478_v15, %v1188_v13  ;;  %v1495_v7 = vmax.f32 %v3480_v16, %v1381_v3  ;;  %1737 = vmatprep.subr.bf16.mxu0 %v1569_v0  ;;  %v1600_v39 = vpop.permute.xlu1 %1599  ;;  %v1605_v0 = vpop.permute.xlu0 %1604 }
 0x1cc   : > { %v1532_v8 = vadd.f32 %v1518_v18, %v1492_v9  ;;  %v1534_v19 = vadd.f32 %v1518_v18, %v1494_v10  ;;  %1850 = vmatprep.subr.bf16.mxu1 %v1571_v1  ;;  %1738 = vmatpush1.bf16.msra.mxu0 %v1568_v54  ;;  %v1544_v11 = vmax.f32 %v1528_v5, 0.0  ;;  %v1546_v22 = vmax.f32 %v1530_v6, 0.0 }
 0x1cd   : > { %v1533_v20 = vadd.f32 %v1518_v18, %v1493_v17  ;;  %v1535_v21 = vadd.f32 %v1518_v18, %v1495_v7  ;;  %1851 = vmatpush1.bf16.msra.mxu1 %v1570_v55  ;;  %v1545_v24 = vmax.f32 %v1529_v14, 0.0  ;;  %v1547_v25 = vmax.f32 %v1531_v4, 0.0 }
 0x1ce   : > { %v1548_v12 = vmax.f32 %v1532_v8, 0.0  ;;  %v1550_v23 = vmax.f32 %v1534_v19, 0.0 }
 0x1cf   : > { %v1549_v26 = vmax.f32 %v1533_v20, 0.0  ;;  %v1551_v27 = vmax.f32 %v1535_v21, 0.0  ;;  %v1610_v1 = vpop.permute.xlu1 %1609 }
 0x1d0   : > { %v1572_v15 = vpack.c.bf16 %v1548_v12, %v1544_v11  ;;  %v1574_v28 = vpack.c.bf16 %v1550_v23, %v1546_v22 }
 0x1d1   : > { %v1573_v16 = vpack.c.bf16 %v1549_v26, %v1545_v24  ;;  %v1575_v29 = vpack.c.bf16 %v1551_v27, %v1547_v25 }
 0x1d3   : > { %1739 = vmatprep.subr.bf16.mxu0 %v1573_v16  ;;  %1852 = vmatprep.subr.bf16.mxu1 %v1575_v29 }
 0x1d4   : > { %1740 = vmatpush1.bf16.msra.mxu0 %v1572_v15  ;;  %1853 = vmatpush1.bf16.msra.mxu1 %v1574_v28 }
 0x1d7   : > { %2624 = vmatmul.mubr.msk.bf16.vlgmr.msra.gmra.mrb[64].mxu0 %vm1712_vm0, %v2854_v30  ;;  %2632 = vmatmul.mubr.msk.bf16.vlgmr.msra.gmra.mrb[64].mxu1 %vm1712_vm0, %v2854_v30 }
 0x1d8   : > { %1779 = vmatprep.mubr.bf16.mxu0 %v2890_v2  ;;  %1892 = vmatprep.mubr.bf16.mxu1 %v2890_v2 }
 0x1df   : > { %2625 = vmatmul.mubr.msk.bf16.gmra.mrb[68].mxu0 %vm1712_vm0, %v2855_v31  ;;  %2633 = vmatmul.mubr.msk.bf16.gmra.mrb[68].mxu1 %vm1712_vm0, %v2855_v31  ;;  %v1615_v31 = vpop.permute.xlu0 %1614 }
 0x1e0   : > { %1789 = vmatprep.mubr.bf16.mxu0 %v2890_v2  ;;  %1902 = vmatprep.mubr.bf16.mxu1 %v2890_v2 }
 0x1e7   : > { %2626 = vmatmul.mubr.msk.bf16.gmra.mrb[72].mxu0 %vm1712_vm0, %v2856_v32  ;;  %2634 = vmatmul.mubr.msk.bf16.gmra.mrb[72].mxu1 %vm1712_vm0, %v2856_v32  ;;  %v1620_v32 = vpop.permute.xlu1 %1619 }
 0x1e8   : > { %1799 = vmatprep.mubr.bf16.mxu0 %v2890_v2  ;;  %1912 = vmatprep.mubr.bf16.mxu1 %v2890_v2 }
 0x1ef   : > { %2627 = vmatmul.mubr.msk.bf16.gmra.mrb[76].mxu0 %vm1712_vm0, %v2857_v33  ;;  %2635 = vmatmul.mubr.msk.bf16.gmra.mrb[76].mxu1 %vm1712_vm0, %v2857_v33 }
 0x1f0   : > { %1809 = vmatprep.mubr.bf16.mxu0 %v2890_v2  ;;  %1922 = vmatprep.mubr.bf16.mxu1 %v2890_v2 }
 0x1f7   : > { %2628 = vmatmul.mubr.msk.bf16.gmra.mrb[80].mxu0 %vm1712_vm0, %v2858_v34  ;;  %2636 = vmatmul.mubr.msk.bf16.gmra.mrb[80].mxu1 %vm1712_vm0, %v2858_v34 }
 0x1f8   : > { %1819 = vmatprep.mubr.bf16.mxu0 %v2890_v2  ;;  %1932 = vmatprep.mubr.bf16.mxu1 %v2890_v2 }
 0x1ff   : > { %2629 = vmatmul.mubr.msk.bf16.gmra.mrb[84].mxu0 %vm1712_vm0, %v2859_v35  ;;  %2637 = vmatmul.mubr.msk.bf16.gmra.mrb[84].mxu1 %vm1712_vm0, %v2859_v35 }
 0x200   : > { %1829 = vmatprep.mubr.bf16.mxu0 %v2890_v2  ;;  %1942 = vmatprep.mubr.bf16.mxu1 %v2890_v2 }
 0x207   : > { %2630 = vmatmul.mubr.msk.bf16.gmra.mrb[88].mxu0 %vm1712_vm0, %v2860_v36  ;;  %2638 = vmatmul.mubr.msk.bf16.gmra.mrb[88].mxu1 %vm1712_vm0, %v2860_v36 }
 0x208   : > { %1839 = vmatprep.mubr.bf16.mxu0 %v2890_v2  ;;  %1952 = vmatprep.mubr.bf16.mxu1 %v2890_v2 }
 0x20f   : > { %2631 = vmatmul.mubr.msk.bf16.gmra.mrb[92].mxu0 %vm1712_vm0, %v2861_v37  ;;  %2639 = vmatmul.mubr.msk.bf16.gmra.mrb[92].mxu1 %vm1712_vm0, %v2861_v37 }
 0x210   : > { %2171 = vmatprep.mubr.bf16.mxu0 %v2890_v2  ;;  %2244 = vmatprep.mubr.bf16.mxu1 %v2890_v2 }
 0x2aa   : > { %v1771_v40 = vpop.f32.mrb[64].mxu0  ;;  %v1884_v41 = vpop.f32.mrb[64].mxu1 }
 0x2ab   : > { %v1772_v42 = vadd.f32 %v1771_v40, %v1595_v38  ;;  %v1885_v43 = vadd.f32 %v1884_v41, %v1595_v38  ;;  %v1773_v44 = vpop.f32.mrb[65].mxu0  ;;  %v1886_v45 = vpop.f32.mrb[65].mxu1 }
 0x2ac   : > { %v1774_v46 = vadd.f32 %v1773_v44, %v1595_v38  ;;  %v1887_v47 = vadd.f32 %v1886_v45, %v1595_v38  ;;  %v1775_v48 = vpop.f32.mrb[66].mxu0  ;;  %v1888_v49 = vpop.f32.mrb[66].mxu1 }
 0x2ad   : > { %v1776_v50 = vadd.f32 %v1775_v48, %v1600_v39  ;;  %v1889_v51 = vadd.f32 %v1888_v49, %v1600_v39  ;;  %v1777_v52 = vpop.f32.mrb[67].mxu0  ;;  %v1890_v53 = vpop.f32.mrb[67].mxu1  ;;  %v1963_v56 = vmax.f32 %v1772_v42, 0.0  ;;  %v1965_v57 = vmax.f32 %v1885_v43, 0.0 }
 0x2ae   : > { %v1778_v54 = vadd.f32 %v1777_v52, %v1600_v39  ;;  %v1891_v55 = vadd.f32 %v1890_v53, %v1600_v39  ;;  %v1964_v60 = vmax.f32 %v1774_v46, 0.0  ;;  %v1966_v61 = vmax.f32 %v1887_v47, 0.0 }
 0x2af   : > { %v1967_v58 = vmax.f32 %v1776_v50, 0.0  ;;  %v1969_v59 = vmax.f32 %v1889_v51, 0.0 }
 0x2b0   : > { %v1968_v62 = vmax.f32 %v1778_v54, 0.0  ;;  %v1970_v63 = vmax.f32 %v1891_v55, 0.0 }
 0x2b1   : > { %v2035_v5 = vpack.c.bf16 %v1967_v58, %v1963_v56  ;;  %v2037_v6 = vpack.c.bf16 %v1969_v59, %v1965_v57 }
 0x2b2   : > { %v2036_v9 = vpack.c.bf16 %v1968_v62, %v1964_v60  ;;  %v2038_v10 = vpack.c.bf16 %v1970_v63, %v1966_v61  ;;  %v1781_v13 = vpop.f32.mrb[68].mxu0  ;;  %v1894_v3 = vpop.f32.mrb[68].mxu1 }
 0x2b3   : > { %v1782_v14 = vadd.f32 %v1781_v13, %v1605_v0  ;;  %v1895_v4 = vadd.f32 %v1894_v3, %v1605_v0  ;;  %v1783_v17 = vpop.f32.mrb[69].mxu0  ;;  %v1896_v7 = vpop.f32.mrb[69].mxu1 }
 0x2b4   : > { %v1784_v18 = vadd.f32 %v1783_v17, %v1605_v0  ;;  %v1897_v8 = vadd.f32 %v1896_v7, %v1605_v0  ;;  %v1785_v19 = vpop.f32.mrb[70].mxu0  ;;  %v1898_v20 = vpop.f32.mrb[70].mxu1  ;;  %2139 = vmatprep.subr.bf16.mxu0 %v2036_v9  ;;  %2212 = vmatprep.subr.bf16.mxu1 %v2038_v10 }
 0x2b5   : > { %v1786_v21 = vadd.f32 %v1785_v19, %v1610_v1  ;;  %v1899_v11 = vadd.f32 %v1898_v20, %v1610_v1  ;;  %v1787_v22 = vpop.f32.mrb[71].mxu0  ;;  %v1900_v12 = vpop.f32.mrb[71].mxu1  ;;  %2140 = vmatpush1.bf16.msra.mxu0 %v2035_v5  ;;  %2213 = vmatpush1.bf16.msra.mxu1 %v2037_v6  ;;  %v1971_v25 = vmax.f32 %v1782_v14, 0.0  ;;  %v1973_v26 = vmax.f32 %v1895_v4, 0.0 }
 0x2b6   : > { %v1788_v23 = vadd.f32 %v1787_v22, %v1610_v1  ;;  %v1901_v24 = vadd.f32 %v1900_v12, %v1610_v1  ;;  %v1972_v28 = vmax.f32 %v1784_v18, 0.0  ;;  %v1974_v16 = vmax.f32 %v1897_v8, 0.0  ;;  %v1625_v61 = vpop.permute.xlu0 %1624  ;;  %v1630_v62 = vpop.permute.xlu1 %1629 }
 0x2b7   : > { %v1975_v27 = vmax.f32 %v1786_v21, 0.0  ;;  %v1977_v15 = vmax.f32 %v1899_v11, 0.0 }
 0x2b8   : > { %v1976_v29 = vmax.f32 %v1788_v23, 0.0  ;;  %v1978_v30 = vmax.f32 %v1901_v24, 0.0 }
 0x2b9   : > { %v2039_v33 = vpack.c.bf16 %v1975_v27, %v1971_v25  ;;  %v2041_v34 = vpack.c.bf16 %v1977_v15, %v1973_v26 }
 0x2ba   : > { %v2040_v35 = vpack.c.bf16 %v1976_v29, %v1972_v28  ;;  %v2042_v36 = vpack.c.bf16 %v1978_v30, %v1974_v16  ;;  %v1791_v37 = vpop.f32.mrb[72].mxu0  ;;  %v1904_v38 = vpop.f32.mrb[72].mxu1 }
 0x2bb   : > { %v1792_v39 = vadd.f32 %v1791_v37, %v1615_v31  ;;  %v1905_v40 = vadd.f32 %v1904_v38, %v1615_v31  ;;  %v1793_v41 = vpop.f32.mrb[73].mxu0  ;;  %v1906_v42 = vpop.f32.mrb[73].mxu1 }
 0x2bc   : > { %v1794_v43 = vadd.f32 %v1793_v41, %v1615_v31  ;;  %v1907_v44 = vadd.f32 %v1906_v42, %v1615_v31  ;;  %v1795_v45 = vpop.f32.mrb[74].mxu0  ;;  %v1908_v46 = vpop.f32.mrb[74].mxu1  ;;  %2141 = vmatprep.subr.bf16.mxu0 %v2040_v35  ;;  %2214 = vmatprep.subr.bf16.mxu1 %v2042_v36 }
 0x2bd   : > { %v1796_v47 = vadd.f32 %v1795_v45, %v1620_v32  ;;  %v1909_v48 = vadd.f32 %v1908_v46, %v1620_v32  ;;  %v1797_v49 = vpop.f32.mrb[75].mxu0  ;;  %v1910_v50 = vpop.f32.mrb[75].mxu1  ;;  %2142 = vmatpush1.bf16.msra.mxu0 %v2039_v33  ;;  %2215 = vmatpush1.bf16.msra.mxu1 %v2041_v34  ;;  %v1979_v53 = vmax.f32 %v1792_v39, 0.0  ;;  %v1981_v54 = vmax.f32 %v1905_v40, 0.0 }
 0x2be   : > { %v1798_v51 = vadd.f32 %v1797_v49, %v1620_v32  ;;  %v1911_v52 = vadd.f32 %v1910_v50, %v1620_v32  ;;  %v1980_v57 = vmax.f32 %v1794_v43, 0.0  ;;  %v1982_v58 = vmax.f32 %v1907_v44, 0.0  ;;  %v1635_v16 = vpop.permute.xlu0 %1634  ;;  %v1640_v29 = vpop.permute.xlu1 %1639 }
 0x2bf   : > { %v1983_v55 = vmax.f32 %v1796_v47, 0.0  ;;  %v1985_v56 = vmax.f32 %v1909_v48, 0.0 }
 0x2c0   : > { %v1984_v59 = vmax.f32 %v1798_v51, 0.0  ;;  %v1986_v60 = vmax.f32 %v1911_v52, 0.0 }
 0x2c1   : > { %v2043_v63 = vpack.c.bf16 %v1983_v55, %v1979_v53  ;;  %v2045_v0 = vpack.c.bf16 %v1985_v56, %v1981_v54 }
 0x2c2   : > { %v2044_v1 = vpack.c.bf16 %v1984_v59, %v1980_v57  ;;  %v2046_v5 = vpack.c.bf16 %v1986_v60, %v1982_v58  ;;  %v1801_v6 = vpop.f32.mrb[76].mxu0  ;;  %v1914_v9 = vpop.f32.mrb[76].mxu1 }
 0x2c3   : > { %v1802_v10 = vadd.f32 %v1801_v6, %v1625_v61  ;;  %v1915_v13 = vadd.f32 %v1914_v9, %v1625_v61  ;;  %v1803_v3 = vpop.f32.mrb[77].mxu0  ;;  %v1916_v14 = vpop.f32.mrb[77].mxu1 }
 0x2c4   : > { %v1804_v4 = vadd.f32 %v1803_v3, %v1625_v61  ;;  %v1917_v17 = vadd.f32 %v1916_v14, %v1625_v61  ;;  %v1805_v7 = vpop.f32.mrb[78].mxu0  ;;  %v1918_v18 = vpop.f32.mrb[78].mxu1  ;;  %2143 = vmatprep.subr.bf16.mxu0 %v2044_v1  ;;  %2216 = vmatprep.subr.bf16.mxu1 %v2046_v5 }
 0x2c5   : > { %v1806_v8 = vadd.f32 %v1805_v7, %v1630_v62  ;;  %v1919_v19 = vadd.f32 %v1918_v18, %v1630_v62  ;;  %v1807_v20 = vpop.f32.mrb[79].mxu0  ;;  %v1920_v21 = vpop.f32.mrb[79].mxu1  ;;  %2144 = vmatpush1.bf16.msra.mxu0 %v2043_v63  ;;  %2217 = vmatpush1.bf16.msra.mxu1 %v2045_v0  ;;  %v1987_v12 = vmax.f32 %v1802_v10, 0.0  ;;  %v1989_v23 = vmax.f32 %v1915_v13, 0.0 }
 0x2c6   : > { %v1808_v11 = vadd.f32 %v1807_v20, %v1630_v62  ;;  %v1921_v22 = vadd.f32 %v1920_v21, %v1630_v62  ;;  %v1988_v26 = vmax.f32 %v1804_v4, 0.0  ;;  %v1990_v27 = vmax.f32 %v1917_v17, 0.0  ;;  %v1645_v58 = vpop.permute.xlu0 %1644  ;;  %v1650_v59 = vpop.permute.xlu1 %1649 }
 0x2c7   : > { %v1991_v24 = vmax.f32 %v1806_v8, 0.0  ;;  %v1993_v25 = vmax.f32 %v1919_v19, 0.0 }
 0x2c8   : > { %v1992_v15 = vmax.f32 %v1808_v11, 0.0  ;;  %v1994_v28 = vmax.f32 %v1921_v22, 0.0 }
 0x2c9   : > { %v2047_v30 = vpack.c.bf16 %v1991_v24, %v1987_v12  ;;  %v2049_v31 = vpack.c.bf16 %v1993_v25, %v1989_v23 }
 0x2ca   : > { %v2048_v32 = vpack.c.bf16 %v1992_v15, %v1988_v26  ;;  %v2050_v33 = vpack.c.bf16 %v1994_v28, %v1990_v27  ;;  %v1811_v34 = vpop.f32.mrb[80].mxu0  ;;  %v1924_v35 = vpop.f32.mrb[80].mxu1 }
 0x2cb   : > { %v1812_v36 = vadd.f32 %v1811_v34, %v1635_v16  ;;  %v1925_v37 = vadd.f32 %v1924_v35, %v1635_v16  ;;  %v1813_v38 = vpop.f32.mrb[81].mxu0  ;;  %v1926_v39 = vpop.f32.mrb[81].mxu1 }
 0x2cc   : > { %v1814_v40 = vadd.f32 %v1813_v38, %v1635_v16  ;;  %v1927_v41 = vadd.f32 %v1926_v39, %v1635_v16  ;;  %v1815_v42 = vpop.f32.mrb[82].mxu0  ;;  %v1928_v43 = vpop.f32.mrb[82].mxu1  ;;  %2145 = vmatprep.subr.bf16.mxu0 %v2048_v32  ;;  %2218 = vmatprep.subr.bf16.mxu1 %v2050_v33 }
 0x2cd   : > { %v1816_v44 = vadd.f32 %v1815_v42, %v1640_v29  ;;  %v1929_v45 = vadd.f32 %v1928_v43, %v1640_v29  ;;  %v1817_v46 = vpop.f32.mrb[83].mxu0  ;;  %v1930_v47 = vpop.f32.mrb[83].mxu1  ;;  %2146 = vmatpush1.bf16.msra.mxu0 %v2047_v30  ;;  %2219 = vmatpush1.bf16.msra.mxu1 %v2049_v31  ;;  %v1995_v50 = vmax.f32 %v1812_v36, 0.0  ;;  %v1997_v51 = vmax.f32 %v1925_v37, 0.0 }
 0x2ce   : > { %v1818_v48 = vadd.f32 %v1817_v46, %v1640_v29  ;;  %v1931_v49 = vadd.f32 %v1930_v47, %v1640_v29  ;;  %v1996_v54 = vmax.f32 %v1814_v40, 0.0  ;;  %v1998_v55 = vmax.f32 %v1927_v41, 0.0  ;;  %v1655_v27 = vpop.permute.xlu0 %1654  ;;  %v1660_v15 = vpop.permute.xlu1 %1659 }
 0x2cf   : > { %v1999_v52 = vmax.f32 %v1816_v44, 0.0  ;;  %v2001_v53 = vmax.f32 %v1929_v45, 0.0 }
 0x2d0   : > { %v2000_v56 = vmax.f32 %v1818_v48, 0.0  ;;  %v2002_v57 = vmax.f32 %v1931_v49, 0.0 }
 0x2d1   : > { %v2051_v60 = vpack.c.bf16 %v1999_v52, %v1995_v50  ;;  %v2053_v61 = vpack.c.bf16 %v2001_v53, %v1997_v51 }
 0x2d2   : > { %v2052_v62 = vpack.c.bf16 %v2000_v56, %v1996_v54  ;;  %v2054_v63 = vpack.c.bf16 %v2002_v57, %v1998_v55  ;;  %v1821_v0 = vpop.f32.mrb[84].mxu0  ;;  %v1934_v1 = vpop.f32.mrb[84].mxu1 }
 0x2d3   : > { %v1822_v5 = vadd.f32 %v1821_v0, %v1645_v58  ;;  %v1935_v6 = vadd.f32 %v1934_v1, %v1645_v58  ;;  %v1823_v9 = vpop.f32.mrb[85].mxu0  ;;  %v1936_v10 = vpop.f32.mrb[85].mxu1 }
 0x2d4   : > { %v1824_v13 = vadd.f32 %v1823_v9, %v1645_v58  ;;  %v1937_v3 = vadd.f32 %v1936_v10, %v1645_v58  ;;  %v1825_v14 = vpop.f32.mrb[86].mxu0  ;;  %v1938_v4 = vpop.f32.mrb[86].mxu1  ;;  %2147 = vmatprep.subr.bf16.mxu0 %v2052_v62  ;;  %2220 = vmatprep.subr.bf16.mxu1 %v2054_v63 }
 0x2d5   : > { %v1826_v17 = vadd.f32 %v1825_v14, %v1650_v59  ;;  %v1939_v7 = vadd.f32 %v1938_v4, %v1650_v59  ;;  %v1827_v18 = vpop.f32.mrb[87].mxu0  ;;  %v1940_v8 = vpop.f32.mrb[87].mxu1  ;;  %2148 = vmatpush1.bf16.msra.mxu0 %v2051_v60  ;;  %2221 = vmatpush1.bf16.msra.mxu1 %v2053_v61  ;;  %v2003_v21 = vmax.f32 %v1822_v5, 0.0  ;;  %v2005_v11 = vmax.f32 %v1935_v6, 0.0 }
 0x2d6   : > { %v1828_v19 = vadd.f32 %v1827_v18, %v1650_v59  ;;  %v1941_v20 = vadd.f32 %v1940_v8, %v1650_v59  ;;  %v2004_v23 = vmax.f32 %v1824_v13, 0.0  ;;  %v2006_v24 = vmax.f32 %v1937_v3, 0.0  ;;  %v1665_v55 = vpop.permute.xlu0 %1664  ;;  %v1670_v56 = vpop.permute.xlu1 %1669 }
 0x2d7   : > { %v2007_v22 = vmax.f32 %v1826_v17, 0.0  ;;  %v2009_v12 = vmax.f32 %v1939_v7, 0.0 }
 0x2d8   : > { %v2008_v25 = vmax.f32 %v1828_v19, 0.0  ;;  %v2010_v26 = vmax.f32 %v1941_v20, 0.0 }
 0x2d9   : > { %v2055_v28 = vpack.c.bf16 %v2007_v22, %v2003_v21  ;;  %v2057_v16 = vpack.c.bf16 %v2009_v12, %v2005_v11 }
 0x2da   : > { %v2056_v29 = vpack.c.bf16 %v2008_v25, %v2004_v23  ;;  %v2058_v30 = vpack.c.bf16 %v2010_v26, %v2006_v24  ;;  %v1831_v31 = vpop.f32.mrb[88].mxu0  ;;  %v1944_v32 = vpop.f32.mrb[88].mxu1 }
 0x2db   : > { %v1832_v33 = vadd.f32 %v1831_v31, %v1655_v27  ;;  %v1945_v34 = vadd.f32 %v1944_v32, %v1655_v27  ;;  %v1833_v35 = vpop.f32.mrb[89].mxu0  ;;  %v1946_v36 = vpop.f32.mrb[89].mxu1 }
 0x2dc   : > { %v1834_v37 = vadd.f32 %v1833_v35, %v1655_v27  ;;  %v1947_v38 = vadd.f32 %v1946_v36, %v1655_v27  ;;  %v1835_v39 = vpop.f32.mrb[90].mxu0  ;;  %v1948_v40 = vpop.f32.mrb[90].mxu1  ;;  %2149 = vmatprep.subr.bf16.mxu0 %v2056_v29  ;;  %2222 = vmatprep.subr.bf16.mxu1 %v2058_v30  ;;  %v2865_v29 = vld [vmem:[%s3622_s5 + $0x18] sm:$0xff]  }
 0x2dd   : > { %v1836_v41 = vadd.f32 %v1835_v39, %v1660_v15  ;;  %v1949_v42 = vadd.f32 %v1948_v40, %v1660_v15  ;;  %v1837_v43 = vpop.f32.mrb[91].mxu0  ;;  %v1950_v44 = vpop.f32.mrb[91].mxu1  ;;  %2150 = vmatpush1.bf16.msra.mxu0 %v2055_v28  ;;  %2223 = vmatpush1.bf16.msra.mxu1 %v2057_v16  ;;  %v2011_v47 = vmax.f32 %v1832_v33, 0.0  ;;  %v2013_v48 = vmax.f32 %v1945_v34, 0.0  ;;  %v2863_v28 = vld [vmem:[%s3622_s5 + $0x8] sm:$0xff]   ;;  %v2864_v16 = vld [vmem:[%s3622_s5 + $0x10] sm:$0xff]  }
 0x2de   : > { %v1838_v45 = vadd.f32 %v1837_v43, %v1660_v15  ;;  %v1951_v46 = vadd.f32 %v1950_v44, %v1660_v15  ;;  %v2012_v51 = vmax.f32 %v1834_v37, 0.0  ;;  %v2014_v52 = vmax.f32 %v1947_v38, 0.0  ;;  %v2862_v15 = vld [vmem:[%s3622_s5] sm:$0xff]   ;;  %v2078_v30 = vpop.permute.xlu0 %2077  ;;  %v2083_v31 = vpop.permute.xlu1 %2082 }
 0x2df   : > { %v2015_v49 = vmax.f32 %v1836_v41, 0.0  ;;  %v2017_v50 = vmax.f32 %v1949_v42, 0.0 }
 0x2e0   : > { %v2016_v53 = vmax.f32 %v1838_v45, 0.0  ;;  %v2018_v54 = vmax.f32 %v1951_v46, 0.0 }
 0x2e1   : > { %v2059_v57 = vpack.c.bf16 %v2015_v49, %v2011_v47  ;;  %v2061_v58 = vpack.c.bf16 %v2017_v50, %v2013_v48 }
 0x2e2   : > { %v2060_v59 = vpack.c.bf16 %v2016_v53, %v2012_v51  ;;  %v2062_v60 = vpack.c.bf16 %v2018_v54, %v2014_v52  ;;  %v1841_v61 = vpop.f32.mrb[92].mxu0  ;;  %v1954_v62 = vpop.f32.mrb[92].mxu1 }
 0x2e3   : > { %v1842_v63 = vadd.f32 %v1841_v61, %v1665_v55  ;;  %v1955_v0 = vadd.f32 %v1954_v62, %v1665_v55  ;;  %v1843_v1 = vpop.f32.mrb[93].mxu0  ;;  %v1956_v5 = vpop.f32.mrb[93].mxu1 }
 0x2e4   : > { %v1844_v6 = vadd.f32 %v1843_v1, %v1665_v55  ;;  %v1957_v9 = vadd.f32 %v1956_v5, %v1665_v55  ;;  %v1845_v10 = vpop.f32.mrb[94].mxu0  ;;  %v1958_v13 = vpop.f32.mrb[94].mxu1  ;;  %2151 = vmatprep.subr.bf16.mxu0 %v2060_v59  ;;  %2224 = vmatprep.subr.bf16.mxu1 %v2062_v60 }
 0x2e5   : > { %v1846_v3 = vadd.f32 %v1845_v10, %v1670_v56  ;;  %v1959_v14 = vadd.f32 %v1958_v13, %v1670_v56  ;;  %v1847_v4 = vpop.f32.mrb[95].mxu0  ;;  %v1960_v17 = vpop.f32.mrb[95].mxu1  ;;  %2152 = vmatpush1.bf16.msra.mxu0 %v2059_v57  ;;  %2225 = vmatpush1.bf16.msra.mxu1 %v2061_v58  ;;  %v2019_v8 = vmax.f32 %v1842_v63, 0.0  ;;  %v2021_v19 = vmax.f32 %v1955_v0, 0.0 }
 0x2e6   : > { %v1848_v7 = vadd.f32 %v1847_v4, %v1670_v56  ;;  %v1961_v18 = vadd.f32 %v1960_v17, %v1670_v56  ;;  %v2020_v11 = vmax.f32 %v1844_v6, 0.0  ;;  %v2022_v22 = vmax.f32 %v1957_v9, 0.0  ;;  %v2088_v51 = vpop.permute.xlu0 %2087  ;;  %v2093_v52 = vpop.permute.xlu1 %2092 }
 0x2e7   : > { %v2023_v20 = vmax.f32 %v1846_v3, 0.0  ;;  %v2025_v21 = vmax.f32 %v1959_v14, 0.0 }
 0x2e8   : > { %v2024_v12 = vmax.f32 %v1848_v7, 0.0  ;;  %v2026_v23 = vmax.f32 %v1961_v18, 0.0 }
 0x2e9   : > { %v2063_v24 = vpack.c.bf16 %v2023_v20, %v2019_v8  ;;  %v2065_v25 = vpack.c.bf16 %v2025_v21, %v2021_v19 }
 0x2ea   : > { %v2064_v26 = vpack.c.bf16 %v2024_v12, %v2020_v11  ;;  %v2066_v27 = vpack.c.bf16 %v2026_v23, %v2022_v22  ;;  %v2098_v4 = vpop.permute.xlu0 %2097  ;;  %v2103_v17 = vpop.permute.xlu1 %2102 }
 0x2ec   : > { %2153 = vmatprep.subr.bf16.mxu0 %v2064_v26  ;;  %2226 = vmatprep.subr.bf16.mxu1 %v2066_v27 }
 0x2ed   : > { %2154 = vmatpush1.bf16.msra.mxu0 %v2063_v24  ;;  %2227 = vmatpush1.bf16.msra.mxu1 %v2065_v25 }
 0x2f0   : > { %2172 = vmatmul.mubr.bf16.vlgmr.msra.gmra.mrb[96].mxu0 %v2862_v15  ;;  %2245 = vmatmul.mubr.bf16.vlgmr.msra.gmra.mrb[96].mxu1 %v2862_v15 }
 0x2f1   : > { %2181 = vmatprep.mubr.bf16.mxu0 %v2890_v2  ;;  %2254 = vmatprep.mubr.bf16.mxu1 %v2890_v2 }
 0x2f8   : > { %2182 = vmatmul.mubr.bf16.gmra.mrb[100].mxu0 %v2863_v28  ;;  %2255 = vmatmul.mubr.bf16.gmra.mrb[100].mxu1 %v2863_v28 }
 0x2f9   : > { %2191 = vmatprep.mubr.bf16.mxu0 %v2890_v2  ;;  %2264 = vmatprep.mubr.bf16.mxu1 %v2890_v2 }
 0x300   : > { %2192 = vmatmul.mubr.bf16.gmra.mrb[104].mxu0 %v2864_v16  ;;  %2265 = vmatmul.mubr.bf16.gmra.mrb[104].mxu1 %v2864_v16 }
 0x301   : > { %2201 = vmatprep.mubr.bf16.mxu0 %v2890_v2  ;;  %2274 = vmatprep.mubr.bf16.mxu1 %v2890_v2 }
 0x308   : > { %2202 = vmatmul.mubr.bf16.gmra.mrb[108].mxu0 %v2865_v29  ;;  %2275 = vmatmul.mubr.bf16.gmra.mrb[108].mxu1 %v2865_v29 }
 0x3c3   : > { %v2173_v32 = vpop.f32.mrb[96].mxu0  ;;  %v2246_v33 = vpop.f32.mrb[96].mxu1 }
 0x3c4   : > { %v2174_v34 = vadd.f32 %v2173_v32, %v2078_v30  ;;  %v2247_v35 = vadd.f32 %v2246_v33, %v2078_v30  ;;  %v2175_v36 = vpop.f32.mrb[97].mxu0  ;;  %v2248_v37 = vpop.f32.mrb[97].mxu1 }
 0x3c5   : > { %v2176_v38 = vadd.f32 %v2175_v36, %v2078_v30  ;;  %v2249_v39 = vadd.f32 %v2248_v37, %v2078_v30  ;;  %v2177_v40 = vpop.f32.mrb[98].mxu0  ;;  %v2250_v2 = vpop.f32.mrb[98].mxu1 }
 0x3c6   : > { %v2178_v41 = vadd.f32 %v2177_v40, %v2083_v31  ;;  %v2251_v42 = vadd.f32 %v2250_v2, %v2083_v31  ;;  %v2179_v43 = vpop.f32.mrb[99].mxu0  ;;  %v2252_v44 = vpop.f32.mrb[99].mxu1 }
 0x3c7   : > { %v2666_v45 = vpack.c.bf16 %v2176_v38, %v2174_v34  ;;  %v2667_v46 = vpack.c.bf16 %v2249_v39, %v2247_v35  ;;  %v2180_v47 = vadd.f32 %v2179_v43, %v2083_v31  ;;  %v2253_v48 = vadd.f32 %v2252_v44, %v2083_v31  ;;  %v2108_v32 = vpop.permute.xlu0 %2107  ;;  %v2113_v33 = vpop.permute.xlu1 %2112 }
 0x3c9   : > { %2381 = vst [vmem:[%s3566_s14] sm:$0xff] %v2666_v45  ;;  %2382 = vst [vmem:[%s3566_s14 + $0x8] sm:$0xff] %v2667_v46  ;;  %v2668_v49 = vpack.c.bf16 %v2180_v47, %v2178_v41  ;;  %v2669_v50 = vpack.c.bf16 %v2253_v48, %v2251_v42 }
 0x3cb   : > { %2383 = vst [vmem:[%s3566_s14 + $0x10] sm:$0xff] %v2668_v49  ;;  %2384 = vst [vmem:[%s3566_s14 + $0x18] sm:$0xff] %v2669_v50  ;;  %v2183_v53 = vpop.f32.mrb[100].mxu0  ;;  %v2256_v54 = vpop.f32.mrb[100].mxu1 }
 0x3cc   : > { %v2184_v55 = vadd.f32 %v2183_v53, %v2088_v51  ;;  %v2257_v56 = vadd.f32 %v2256_v54, %v2088_v51  ;;  %v2185_v57 = vpop.f32.mrb[101].mxu0  ;;  %v2258_v58 = vpop.f32.mrb[101].mxu1 }
 0x3cd   : > { %v2186_v59 = vadd.f32 %v2185_v57, %v2088_v51  ;;  %v2259_v60 = vadd.f32 %v2258_v58, %v2088_v51  ;;  %v2187_v61 = vpop.f32.mrb[102].mxu0  ;;  %v2260_v62 = vpop.f32.mrb[102].mxu1 }
 0x3ce   : > { %v2188_v63 = vadd.f32 %v2187_v61, %v2093_v52  ;;  %v2261_v0 = vadd.f32 %v2260_v62, %v2093_v52  ;;  %v2189_v1 = vpop.f32.mrb[103].mxu0  ;;  %v2262_v5 = vpop.f32.mrb[103].mxu1 }
 0x3cf   : > { %v2670_v6 = vpack.c.bf16 %v2186_v59, %v2184_v55  ;;  %v2671_v9 = vpack.c.bf16 %v2259_v60, %v2257_v56  ;;  %v2190_v10 = vadd.f32 %v2189_v1, %v2093_v52  ;;  %v2263_v13 = vadd.f32 %v2262_v5, %v2093_v52 }
 0x3d0   : > { %v2419_v53 = vld [vmem:[%s3566_s14] sm:$0xff] (%p2961_p5)  ;;  %v2421_v54 = vld [vmem:[%s3566_s14 + $0x8] sm:$0xff] (%p2961_p5) }
 0x3d1   : > { %2385 = vst [vmem:[%s3566_s14 + $0x20] sm:$0xff] %v2670_v6  ;;  %2386 = vst [vmem:[%s3566_s14 + $0x28] sm:$0xff] %v2671_v9  ;;  %v2672_v3 = vpack.c.bf16 %v2190_v10, %v2188_v63  ;;  %v2673_v14 = vpack.c.bf16 %v2263_v13, %v2261_v0 }
 0x3d2   : > { %v2423_v55 = vld [vmem:[%s3566_s14 + $0x10] sm:$0xff] (%p2961_p5)  ;;  %v2425_v56 = vld [vmem:[%s3566_s14 + $0x18] sm:$0xff] (%p2961_p5)  ;;  %2420 = vst [vmem:[%s2406_s9] sm:$0xff] (%p2961_p5), %v2419_v53  ;;  %2422 = vst [vmem:[%s2406_s9 + $0x8] sm:$0xff] (%p2961_p5), %v2421_v54 }
 0x3d3   : > { %2387 = vst [vmem:[%s3566_s14 + $0x30] sm:$0xff] %v2672_v3  ;;  %2388 = vst [vmem:[%s3566_s14 + $0x38] sm:$0xff] %v2673_v14  ;;  %v2193_v7 = vpop.f32.mrb[104].mxu0  ;;  %v2266_v18 = vpop.f32.mrb[104].mxu1 }
 0x3d4   : > { %v2194_v8 = vadd.f32 %v2193_v7, %v2098_v4  ;;  %v2267_v19 = vadd.f32 %v2266_v18, %v2098_v4  ;;  %v2195_v20 = vpop.f32.mrb[105].mxu0  ;;  %v2268_v21 = vpop.f32.mrb[105].mxu1  ;;  %2424 = vst [vmem:[%s2406_s9 + $0x20] sm:$0xff] (%p2961_p5), %v2423_v55  ;;  %2426 = vst [vmem:[%s2406_s9 + $0x28] sm:$0xff] (%p2961_p5), %v2425_v56 }
 0x3d5   : > { %v2196_v11 = vadd.f32 %v2195_v20, %v2098_v4  ;;  %v2269_v22 = vadd.f32 %v2268_v21, %v2098_v4  ;;  %v2197_v12 = vpop.f32.mrb[106].mxu0  ;;  %v2270_v23 = vpop.f32.mrb[106].mxu1 }
 0x3d6   : > { %v2198_v24 = vadd.f32 %v2197_v12, %v2103_v17  ;;  %v2271_v25 = vadd.f32 %v2270_v23, %v2103_v17  ;;  %v2199_v26 = vpop.f32.mrb[107].mxu0  ;;  %v2272_v27 = vpop.f32.mrb[107].mxu1 }
 0x3d7   : > { %v2674_v15 = vpack.c.bf16 %v2196_v11, %v2194_v8  ;;  %v2675_v28 = vpack.c.bf16 %v2269_v22, %v2267_v19  ;;  %v2200_v16 = vadd.f32 %v2199_v26, %v2103_v17  ;;  %v2273_v29 = vadd.f32 %v2272_v27, %v2103_v17 }
 0x3d8   : > { %v2427_v57 = vld [vmem:[%s3566_s14 + $0x20] sm:$0xff] (%p2961_p5)  ;;  %v2429_v58 = vld [vmem:[%s3566_s14 + $0x28] sm:$0xff] (%p2961_p5) }
 0x3d9   : > { %2389 = vst [vmem:[%s3566_s14 + $0x40] sm:$0xff] %v2674_v15  ;;  %2390 = vst [vmem:[%s3566_s14 + $0x48] sm:$0xff] %v2675_v28  ;;  %v2676_v30 = vpack.c.bf16 %v2200_v16, %v2198_v24  ;;  %v2677_v31 = vpack.c.bf16 %v2273_v29, %v2271_v25 }
 0x3da   : > { %2428 = vst [vmem:[%s2406_s9 + $0x40] sm:$0xff] (%p2961_p5), %v2427_v57  ;;  %2430 = vst [vmem:[%s2406_s9 + $0x48] sm:$0xff] (%p2961_p5), %v2429_v58  ;;  %v2431_v59 = vld [vmem:[%s3566_s14 + $0x30] sm:$0xff] (%p2961_p5)  ;;  %v2433_v60 = vld [vmem:[%s3566_s14 + $0x38] sm:$0xff] (%p2961_p5) }
 0x3db   : > { %2391 = vst [vmem:[%s3566_s14 + $0x50] sm:$0xff] %v2676_v30  ;;  %2392 = vst [vmem:[%s3566_s14 + $0x58] sm:$0xff] %v2677_v31  ;;  %v2203_v34 = vpop.f32.mrb[108].mxu0  ;;  %v2276_v35 = vpop.f32.mrb[108].mxu1 }
 0x3dc   : > { %v2204_v36 = vadd.f32 %v2203_v34, %v2108_v32  ;;  %v2277_v37 = vadd.f32 %v2276_v35, %v2108_v32  ;;  %v2205_v38 = vpop.f32.mrb[109].mxu0  ;;  %v2278_v39 = vpop.f32.mrb[109].mxu1  ;;  %2432 = vst [vmem:[%s2406_s9 + $0x60] sm:$0xff] (%p2961_p5), %v2431_v59  ;;  %2434 = vst [vmem:[%s2406_s9 + $0x68] sm:$0xff] (%p2961_p5), %v2433_v60 }
 0x3dd   : > { %v2206_v40 = vadd.f32 %v2205_v38, %v2108_v32  ;;  %v2279_v2 = vadd.f32 %v2278_v39, %v2108_v32  ;;  %v2207_v41 = vpop.f32.mrb[110].mxu0  ;;  %v2280_v42 = vpop.f32.mrb[110].mxu1  ;;  %2403 = sbr.rel (!%p2961_p5) target bundleno = 1004 (0x3ec), region = 75 }
 0x3de   : > { %v2208_v43 = vadd.f32 %v2207_v41, %v2113_v33  ;;  %v2281_v44 = vadd.f32 %v2280_v42, %v2113_v33  ;;  %v2209_v45 = vpop.f32.mrb[111].mxu0  ;;  %v2282_v46 = vpop.f32.mrb[111].mxu1 }
 0x3df   : > { %v2678_v47 = vpack.c.bf16 %v2206_v40, %v2204_v36  ;;  %v2679_v48 = vpack.c.bf16 %v2279_v2, %v2277_v37  ;;  %v2210_v49 = vadd.f32 %v2209_v45, %v2113_v33  ;;  %v2283_v50 = vadd.f32 %v2282_v46, %v2113_v33 }
 0x3e0   : > { %v2435_v61 = vld [vmem:[%s3566_s14 + $0x40] sm:$0xff] (%p2961_p5)  ;;  %v2437_v62 = vld [vmem:[%s3566_s14 + $0x48] sm:$0xff] (%p2961_p5) }
 0x3e1   : > { %2393 = vst [vmem:[%s3566_s14 + $0x60] sm:$0xff] %v2678_v47  ;;  %2394 = vst [vmem:[%s3566_s14 + $0x68] sm:$0xff] %v2679_v48  ;;  %v2680_v51 = vpack.c.bf16 %v2210_v49, %v2208_v43  ;;  %v2681_v52 = vpack.c.bf16 %v2283_v50, %v2281_v44 }
 0x3e2   : > { %2436 = vst [vmem:[%s2406_s9 + $0x80] sm:$0xff] (%p2961_p5), %v2435_v61  ;;  %v2439_v63 = vld [vmem:[%s3566_s14 + $0x50] sm:$0xff] (%p2961_p5)  ;;  %v2441_v0 = vld [vmem:[%s3566_s14 + $0x58] sm:$0xff] (%p2961_p5)  ;;  %2438 = vst [vmem:[%s2406_s9 + $0x88] sm:$0xff] (%p2961_p5), %v2437_v62 }
 0x3e3   : > { %2395 = vst [vmem:[%s3566_s14 + $0x70] sm:$0xff] %v2680_v51  ;;  %2396 = vst [vmem:[%s3566_s14 + $0x78] sm:$0xff] %v2681_v52 }
 0x3e4   : > { %2440 = vst [vmem:[%s2406_s9 + $0xa0] sm:$0xff] %v2439_v63  ;;  %2442 = vst [vmem:[%s2406_s9 + $0xa8] sm:$0xff] %v2441_v0 }
 0x3e8   : > { %v2443_v1 = vld [vmem:[%s3566_s14 + $0x60] sm:$0xff]  ;;  %v2445_v5 = vld [vmem:[%s3566_s14 + $0x68] sm:$0xff] }
 0x3e9   : > { %2444 = vst [vmem:[%s2406_s9 + $0xc0] sm:$0xff] %v2443_v1  ;;  %2446 = vst [vmem:[%s2406_s9 + $0xc8] sm:$0xff] %v2445_v5 }
 0x3ea   : > { %v2447_v6 = vld [vmem:[%s3566_s14 + $0x70] sm:$0xff]  ;;  %v2449_v9 = vld [vmem:[%s3566_s14 + $0x78] sm:$0xff] }
 0x3eb   : > { %2448 = vst [vmem:[%s2406_s9 + $0xe0] sm:$0xff] %v2447_v6  ;;  %2450 = vst [vmem:[%s2406_s9 + $0xe8] sm:$0xff] %v2449_v9 }
 0x3ec PF: > { %p14_p10 = scmp.ge.s32.totalorder %s2948_s28, 4   ;;  %s3626_s24 = smov %s2884_s25 }
 0x3ed   : > { %s3627_s25 = smov %s2959_s8  ;;  %s3628_s26 = smov %s2948_s28 }
 0x3ee   :  { %16 = sbr.rel (!%p14_p10) target bundleno = 2 (0x2), region = 129 }

</bundles_post_ra>
